<compile_context>
chip_gen: v7x
topology: tpu7x:2x2x1
jax: 0.10.0
libtpu: 0.0.40
codegen_flags: <defaults>
</compile_context>

<pallas_src>
import numpy as np

import jax
import jax.numpy as jnp
from jax import lax
from jax.experimental import pallas as pl
from jax.experimental.pallas import tpu as pltpu

BN_EPS = 1e-5
LEAKY_SLOPE = 0.01  # torch.nn.functional.leaky_relu default


# --------------------------------------------------------------------------
# Fused Pallas kernel (one batch element per grid step)
# --------------------------------------------------------------------------
def make_fused_kernel(n_conv, K_list, n_fc):
    """Builds the fused per-batch kernel, specialized on layer counts / K."""

    def kernel(*refs):
        it = iter(refs)
        x_ref = next(it)
        s0_ref = next(it)
        sh0_ref = next(it)
        conv_p = [tuple(next(it) for _ in range(5)) for _ in range(n_conv)]
        fc_p = []
        for i in range(n_fc):
            cnt = 5 if i == 1 else 4            # fc1 has split (Wa, Wb) weights
            fc_p.append(tuple(next(it) for _ in range(cnt)))
        out_ref = next(it)
        raw_refs = [next(it) for _ in range(n_conv)]
        l_ref = next(it)

        # ---- BatchNorm1d(6) (eval) folded into the kernel -------------------
        x = x_ref[0]                                    # (N, in_dim)
        h = x * s0_ref[...] + sh0_ref[...]

        # ---- Graph Laplacian: L = I - D^-1/2 exp(-pdist(xyz)) D^-1/2 --------
        n = h.shape[0]
        xyz = h[:, :3]                                  # (N, 3)
        inner = lax.dot_general(xyz, xyz, (((1,), (1,)), ((), ())),
                                preferred_element_type=jnp.float32)  # (N, N)
        row = lax.broadcasted_iota(jnp.int32, (n, n), 0)
        col = lax.broadcasted_iota(jnp.int32, (n, n), 1)
        eye = (row == col).astype(jnp.float32)
        sq_row = jnp.sum(xyz * xyz, axis=-1, keepdims=True)        # (N, 1)
        sq_col = jnp.sum(inner * eye, axis=0, keepdims=True)       # (1, N) == sq_row^T
        dist = sq_row - 2.0 * inner + sq_col
        adj = jnp.exp(-dist)                                       # pairwise_distance()
        d_row = jnp.sum(adj, axis=1, keepdims=True)
        d_col = jnp.sum(adj, axis=0, keepdims=True)
        dinv_r = lax.rsqrt(d_row)                                  # EUP slot
        dinv_c = lax.rsqrt(d_col)
        L = eye - adj * dinv_r * dinv_c
        l_ref[0] = L

        # ---- Chebyshev conv stack (single wide matmul per layer) ------------
        x1_skip = None
        for i in range(n_conv):
            w_ref, cb_ref, rb_ref, bs_ref, bsh_ref = conv_p[i]
            K = K_list[i]
            basis = [h]
            if K > 1:
                t1 = jnp.dot(L, h, preferred_element_type=jnp.float32)
                basis.append(t1)
                tp, tc = h, t1
                for _ in range(2, K):
                    tn = 2.0 * jnp.dot(L, tc, preferred_element_type=jnp.float32) - tp
                    basis.append(tn)
                    tp, tc = tc, tn
            T = basis[0] if K == 1 else jnp.concatenate(basis, axis=-1)  # (N, K*Cin)
            acc = jnp.dot(T, w_ref[...], preferred_element_type=jnp.float32)
            raw = acc + cb_ref[...]                     # cheb bias
            raw_refs[i][0] = raw                        # regularization-term copy
            y = raw + rb_ref[...]                       # b2relu bias (N, Cout)
            y = jnp.where(y >= 0.0, y, LEAKY_SLOPE * y)  # leaky_relu
            h = y * bs_ref[...] + bsh_ref[...]          # BN (eval) affine
            if i == 1:
                x1_skip = h

        # ---- FC stack (skip concat fused into fc1 via split weights) --------
        for i in range(n_fc):
            if i == 1:
                wa_ref, wb_ref, bias_ref, bs_ref, bsh_ref = fc_p[i]
                y = (jnp.dot(h, wa_ref[...], preferred_element_type=jnp.float32)
                     + jnp.dot(x1_skip, wb_ref[...], preferred_element_type=jnp.float32))
            else:
                w_ref, bias_ref, bs_ref, bsh_ref = fc_p[i]
                y = jnp.dot(h, w_ref[...], preferred_element_type=jnp.float32)
            # bias_ref = fc bias + b1relu bias, pre-summed on host  (N, Cout)
            y = y + bias_ref[...]
            y = jnp.maximum(y, 0.0)                     # relu; dropout = identity (eval)
            h = y * bs_ref[...] + bsh_ref[...]          # BN (eval) affine
        out_ref[0] = h

    return kernel


# --------------------------------------------------------------------------
# Parameter helpers and model wrapper
# --------------------------------------------------------------------------
def _bn_affine(p):
    scale = p["gamma"] / jnp.sqrt(p["var"] + BN_EPS)
    shift = p["beta"] - p["mean"] * scale
    return scale, shift


def seg_model_forward(params, x):
    """Eval-mode forward; returns (out, self.x, self.L) like the torch module."""
    B, N, in_dim = x.shape
    n_conv = len(params["conv"])
    n_fc = len(params["fc"])
    K_list = [int(p["W"].shape[0]) for p in params["conv"]]

    s0, sh0 = _bn_affine(params["bn0"])
    inputs = [x, s0.reshape(1, in_dim), sh0.reshape(1, in_dim)]
    in_specs = [
        pl.BlockSpec((1, N, in_dim), lambda b: (b, 0, 0)),
        pl.BlockSpec((1, in_dim), lambda b: (0, 0)),
        pl.BlockSpec((1, in_dim), lambda b: (0, 0)),
    ]

    conv_couts = []
    for i in range(n_conv):
        W = params["conv"][i]["W"]                      # (K, Cin, Cout)
        K, Cin, Cout = (int(d) for d in W.shape)
        conv_couts.append(Cout)
        s, sh = _bn_affine(params["bn_conv"][i])
        inputs += [
            W.reshape(K * Cin, Cout),                   # stacked Chebyshev weight
            params["conv"][i]["b"].reshape(1, Cout),    # cheb bias
            params["bias_relu"][i],                     # b2relu bias (N, Cout)
            s.reshape(1, Cout),
            sh.reshape(1, Cout),
        ]
        in_specs += [
            pl.BlockSpec((K * Cin, Cout), lambda b: (0, 0)),
            pl.BlockSpec((1, Cout), lambda b: (0, 0)),
            pl.BlockSpec((N, Cout), lambda b: (0, 0)),
            pl.BlockSpec((1, Cout), lambda b: (0, 0)),
            pl.BlockSpec((1, Cout), lambda b: (0, 0)),
        ]

    fc_couts = []
    m0 = int(params["fc"][0]["W"].shape[1])
    for i in range(n_fc):
        W = params["fc"][i]["W"]                        # (Cin, Cout)
        Cin, Cout = (int(d) for d in W.shape)
        fc_couts.append(Cout)
        s, sh = _bn_affine(params["bn_fc"][i])
        bias_total = (params["fc"][i]["b"].reshape(1, Cout)
                      + params["bias_relu"][i + n_conv])            # (N, Cout)
        if i == 1:
            # fused skip concat: [fc0_out, x1] @ W == fc0_out @ W[:m0] + x1 @ W[m0:]
            inputs += [W[:m0], W[m0:], bias_total,
                       s.reshape(1, Cout), sh.reshape(1, Cout)]
            in_specs += [
                pl.BlockSpec((m0, Cout), lambda b: (0, 0)),
                pl.BlockSpec((Cin - m0, Cout), lambda b: (0, 0)),
                pl.BlockSpec((N, Cout), lambda b: (0, 0)),
                pl.BlockSpec((1, Cout), lambda b: (0, 0)),
                pl.BlockSpec((1, Cout), lambda b: (0, 0)),
            ]
        else:
            inputs += [W, bias_total, s.reshape(1, Cout), sh.reshape(1, Cout)]
            in_specs += [
                pl.BlockSpec((Cin, Cout), lambda b: (0, 0)),
                pl.BlockSpec((N, Cout), lambda b: (0, 0)),
                pl.BlockSpec((1, Cout), lambda b: (0, 0)),
                pl.BlockSpec((1, Cout), lambda b: (0, 0)),
            ]

    out_shape = (
        [jax.ShapeDtypeStruct((B, N, fc_couts[-1]), jnp.float32)]
        + [jax.ShapeDtypeStruct((B, N, c), jnp.float32) for c in conv_couts]
        + [jax.ShapeDtypeStruct((B, N, N), jnp.float32)]
    )
    out_specs = (
        [pl.BlockSpec((1, N, fc_couts[-1]), lambda b: (b, 0, 0))]
        + [pl.BlockSpec((1, N, c), lambda b: (b, 0, 0)) for c in conv_couts]
        + [pl.BlockSpec((1, N, N), lambda b: (b, 0, 0))]
    )

    results = pl.pallas_call(
        make_fused_kernel(n_conv, K_list, n_fc),
        out_shape=tuple(out_shape),
        grid=(B,),
        in_specs=in_specs,
        out_specs=tuple(out_specs),
        compiler_params=pltpu.CompilerParams(
            dimension_semantics=("parallel",)),
    )(*inputs)

    out = results[0]
    xs = list(results[1:1 + n_conv])                   # raw conv outputs (self.x)
    L = results[1 + n_conv]
    Ls = [L] * n_conv                                  # recompute_L=False -> same L
    return out, xs, Ls


# --------------------------------------------------------------------------
# Parameter init (deterministic, synthetic)
# --------------------------------------------------------------------------
def init_params(key, V, F, Kcheb, M, in_dim=6):
    keys = iter(jax.random.split(key, 64))

    def normal(shape, scale=0.1):
        return scale * jax.random.normal(next(keys), shape, jnp.float32)

    def bn(c):
        return dict(
            gamma=1.0 + 0.1 * jax.random.normal(next(keys), (c,), jnp.float32),
            beta=0.1 * jax.random.normal(next(keys), (c,), jnp.float32),
            mean=0.1 * jax.random.normal(next(keys), (c,), jnp.float32),
            var=jax.random.uniform(next(keys), (c,), jnp.float32, 0.5, 1.5),
        )

    params = {}
    params["bn0"] = bn(in_dim)                         # BatchNorm1d(6)
    conv, bn_conv = [], []
    cin = in_dim
    for i in range(len(F)):
        conv.append(dict(W=normal((Kcheb[i], cin, F[i])), b=normal((F[i],))))
        bn_conv.append(bn(F[i]))
        cin = F[i]
    params["conv"], params["bn_conv"] = conv, bn_conv
    fc, bn_fc = [], []
    for i in range(len(M)):
        fin = F[-1] if i == 0 else (M[0] + M[0] if i == 1 else M[i - 1])
        fc.append(dict(W=normal((fin, M[i])), b=normal((M[i],))))
        bn_fc.append(bn(M[i]))
    params["fc"], params["bn_fc"] = fc, bn_fc
    # b2relu=True -> bias of shape (1, vertice, c); stored squeezed as (V, c)
    params["bias_relu"] = [normal((V, c)) for c in (list(F) + list(M))]
    return params


# --------------------------------------------------------------------------
# Pure-JAX reference (for numerical verification)
# --------------------------------------------------------------------------
def reference_forward(params, x):
    s0, sh0 = _bn_affine(params["bn0"])
    x = x * s0 + sh0
    xyz = x[:, :, :3]
    inner = jnp.einsum("bnd,bmd->bnm", xyz, xyz)
    sq = jnp.sum(xyz * xyz, axis=-1, keepdims=True)
    dist = sq - 2.0 * inner + jnp.swapaxes(sq, 1, 2)
    adj = jnp.exp(-dist)
    d = jnp.sum(adj, axis=1)
    dinv = 1.0 / jnp.sqrt(d)
    N = x.shape[1]
    L = jnp.eye(N, dtype=x.dtype)[None] - adj * dinv[:, :, None] * dinv[:, None, :]
    xs, Ls = [], []
    out = x
    x1 = None
    nK = len(params["conv"])
    for i in range(nK):
        W, b = params["conv"][i]["W"], params["conv"][i]["b"]
        K = W.shape[0]
        x0 = out
        y = jnp.einsum("bnc,cf->bnf", x0, W[0])
        if K > 1:
            xa = jnp.matmul(L, x0)
            y = y + jnp.einsum("bnc,cf->bnf", xa, W[1])
            xp, xc = x0, xa
            for k in range(2, K):
                xn = 2.0 * jnp.matmul(L, xc) - xp
                y = y + jnp.einsum("bnc,cf->bnf", xn, W[k])
                xp, xc = xc, xn
        y = y + b
        xs.append(y)
        Ls.append(L)
        y = y + params["bias_relu"][i][None]
        y = jnp.where(y >= 0.0, y, LEAKY_SLOPE * y)
        s, sh = _bn_affine(params["bn_conv"][i])
        out = y * s + sh
        if i == 1:
            x1 = out
    for i in range(len(params["fc"])):
        if i == 1:
            out = jnp.concatenate([out, x1], axis=2)
        y = jnp.einsum("bnc,cf->bnf", out, params["fc"][i]["W"]) + params["fc"][i]["b"]
        y = y + params["bias_relu"][i + nK][None]
        y = jnp.maximum(y, 0.0)
        s, sh = _bn_affine(params["bn_fc"][i])
        out = y * s + sh
    return out, xs, Ls


# --------------------------------------------------------------------------
if __name__ == "__main__":
    B, V = 2, 16
    F = [16, 32, 32]       # F[1] must equal M[0] (skip-concat constraint of the module)
    Kcheb = [3, 3, 3]
    M = [32, 16, 8]

    key = jax.random.PRNGKey(0)
    pkey, xkey = jax.random.split(key)
    params = init_params(pkey, V, F, Kcheb, M, in_dim=6)
    x = jax.random.normal(xkey, (B, V, 6), dtype=jnp.float32)   # xyz + normals

    out, xs, Ls = seg_model_forward(params, x)
    jax.block_until_ready(out)

    ref_out, ref_xs, ref_Ls = reference_forward(params, x)
    assert out.shape == (B, V, M[-1])
    assert np.max(np.abs(np.asarray(Ls[0]) - np.asarray(ref_Ls[0]))) < 5e-2
    for a, r in zip(xs, ref_xs):
        assert np.max(np.abs(np.asarray(a) - np.asarray(r))) < 5e-2
    assert np.max(np.abs(np.asarray(out) - np.asarray(ref_out))) < 5e-2

    print("KERNEL_OK")
</pallas_src>

<mosaic_0001>
module attributes {stable_mosaic.version = 11 : i64} {
  func.func @kernel(%arg0: i32, %arg1: memref<1x16x6xf32, #tpu.memory_space<vmem>>, %arg2: memref<1x6xf32, #tpu.memory_space<vmem>>, %arg3: memref<1x6xf32, #tpu.memory_space<vmem>>, %arg4: memref<18x16xf32, #tpu.memory_space<vmem>>, %arg5: memref<1x16xf32, #tpu.memory_space<vmem>>, %arg6: memref<16x16xf32, #tpu.memory_space<vmem>>, %arg7: memref<1x16xf32, #tpu.memory_space<vmem>>, %arg8: memref<1x16xf32, #tpu.memory_space<vmem>>, %arg9: memref<48x32xf32, #tpu.memory_space<vmem>>, %arg10: memref<1x32xf32, #tpu.memory_space<vmem>>, %arg11: memref<16x32xf32, #tpu.memory_space<vmem>>, %arg12: memref<1x32xf32, #tpu.memory_space<vmem>>, %arg13: memref<1x32xf32, #tpu.memory_space<vmem>>, %arg14: memref<96x32xf32, #tpu.memory_space<vmem>>, %arg15: memref<1x32xf32, #tpu.memory_space<vmem>>, %arg16: memref<16x32xf32, #tpu.memory_space<vmem>>, %arg17: memref<1x32xf32, #tpu.memory_space<vmem>>, %arg18: memref<1x32xf32, #tpu.memory_space<vmem>>, %arg19: memref<32x32xf32, #tpu.memory_space<vmem>>, %arg20: memref<16x32xf32, #tpu.memory_space<vmem>>, %arg21: memref<1x32xf32, #tpu.memory_space<vmem>>, %arg22: memref<1x32xf32, #tpu.memory_space<vmem>>, %arg23: memref<32x16xf32, #tpu.memory_space<vmem>>, %arg24: memref<32x16xf32, #tpu.memory_space<vmem>>, %arg25: memref<16x16xf32, #tpu.memory_space<vmem>>, %arg26: memref<1x16xf32, #tpu.memory_space<vmem>>, %arg27: memref<1x16xf32, #tpu.memory_space<vmem>>, %arg28: memref<16x8xf32, #tpu.memory_space<vmem>>, %arg29: memref<16x8xf32, #tpu.memory_space<vmem>>, %arg30: memref<1x8xf32, #tpu.memory_space<vmem>>, %arg31: memref<1x8xf32, #tpu.memory_space<vmem>>, %arg32: memref<1x16x8xf32, #tpu.memory_space<vmem>>, %arg33: memref<1x16x16xf32, #tpu.memory_space<vmem>>, %arg34: memref<1x16x32xf32, #tpu.memory_space<vmem>>, %arg35: memref<1x16x32xf32, #tpu.memory_space<vmem>>, %arg36: memref<1x16x16xf32, #tpu.memory_space<vmem>>) attributes {dimension_semantics = [#tpu.dimension_semantics<parallel>], iteration_bounds = array<i64: 2>, scalar_prefetch = 0 : i64, scratch_operands = 0 : i64, tpu.core_type = #tpu.core_type<tc>, window_params = [{transform_indices = @transform_0, window_bounds = array<i64: 1, 16, 6>}, {pipeline_mode = #tpu.pipeline_mode<synchronous>, transform_indices = @transform_1, window_bounds = array<i64: 1, 6>}, {pipeline_mode = #tpu.pipeline_mode<synchronous>, transform_indices = @transform_2, window_bounds = array<i64: 1, 6>}, {pipeline_mode = #tpu.pipeline_mode<synchronous>, transform_indices = @transform_3, window_bounds = array<i64: 18, 16>}, {pipeline_mode = #tpu.pipeline_mode<synchronous>, transform_indices = @transform_4, window_bounds = array<i64: 1, 16>}, {pipeline_mode = #tpu.pipeline_mode<synchronous>, transform_indices = @transform_5, window_bounds = array<i64: 16, 16>}, {pipeline_mode = #tpu.pipeline_mode<synchronous>, transform_indices = @transform_6, window_bounds = array<i64: 1, 16>}, {pipeline_mode = #tpu.pipeline_mode<synchronous>, transform_indices = @transform_7, window_bounds = array<i64: 1, 16>}, {pipeline_mode = #tpu.pipeline_mode<synchronous>, transform_indices = @transform_8, window_bounds = array<i64: 48, 32>}, {pipeline_mode = #tpu.pipeline_mode<synchronous>, transform_indices = @transform_9, window_bounds = array<i64: 1, 32>}, {pipeline_mode = #tpu.pipeline_mode<synchronous>, transform_indices = @transform_10, window_bounds = array<i64: 16, 32>}, {pipeline_mode = #tpu.pipeline_mode<synchronous>, transform_indices = @transform_11, window_bounds = array<i64: 1, 32>}, {pipeline_mode = #tpu.pipeline_mode<synchronous>, transform_indices = @transform_12, window_bounds = array<i64: 1, 32>}, {pipeline_mode = #tpu.pipeline_mode<synchronous>, transform_indices = @transform_13, window_bounds = array<i64: 96, 32>}, {pipeline_mode = #tpu.pipeline_mode<synchronous>, transform_indices = @transform_14, window_bounds = array<i64: 1, 32>}, {pipeline_mode = #tpu.pipeline_mode<synchronous>, transform_indices = @transform_15, window_bounds = array<i64: 16, 32>}, {pipeline_mode = #tpu.pipeline_mode<synchronous>, transform_indices = @transform_16, window_bounds = array<i64: 1, 32>}, {pipeline_mode = #tpu.pipeline_mode<synchronous>, transform_indices = @transform_17, window_bounds = array<i64: 1, 32>}, {pipeline_mode = #tpu.pipeline_mode<synchronous>, transform_indices = @transform_18, window_bounds = array<i64: 32, 32>}, {pipeline_mode = #tpu.pipeline_mode<synchronous>, transform_indices = @transform_19, window_bounds = array<i64: 16, 32>}, {pipeline_mode = #tpu.pipeline_mode<synchronous>, transform_indices = @transform_20, window_bounds = array<i64: 1, 32>}, {pipeline_mode = #tpu.pipeline_mode<synchronous>, transform_indices = @transform_21, window_bounds = array<i64: 1, 32>}, {pipeline_mode = #tpu.pipeline_mode<synchronous>, transform_indices = @transform_22, window_bounds = array<i64: 32, 16>}, {pipeline_mode = #tpu.pipeline_mode<synchronous>, transform_indices = @transform_23, window_bounds = array<i64: 32, 16>}, {pipeline_mode = #tpu.pipeline_mode<synchronous>, transform_indices = @transform_24, window_bounds = array<i64: 16, 16>}, {pipeline_mode = #tpu.pipeline_mode<synchronous>, transform_indices = @transform_25, window_bounds = array<i64: 1, 16>}, {pipeline_mode = #tpu.pipeline_mode<synchronous>, transform_indices = @transform_26, window_bounds = array<i64: 1, 16>}, {pipeline_mode = #tpu.pipeline_mode<synchronous>, transform_indices = @transform_27, window_bounds = array<i64: 16, 8>}, {pipeline_mode = #tpu.pipeline_mode<synchronous>, transform_indices = @transform_28, window_bounds = array<i64: 16, 8>}, {pipeline_mode = #tpu.pipeline_mode<synchronous>, transform_indices = @transform_29, window_bounds = array<i64: 1, 8>}, {pipeline_mode = #tpu.pipeline_mode<synchronous>, transform_indices = @transform_30, window_bounds = array<i64: 1, 8>}, {transform_indices = @transform_31, window_bounds = array<i64: 1, 16, 8>}, {transform_indices = @transform_32, window_bounds = array<i64: 1, 16, 16>}, {transform_indices = @transform_33, window_bounds = array<i64: 1, 16, 32>}, {transform_indices = @transform_34, window_bounds = array<i64: 1, 16, 32>}, {transform_indices = @transform_35, window_bounds = array<i64: 1, 16, 16>}]} {
    %c0 = arith.constant 0 : index
    %c0_0 = arith.constant 0 : index
    %c0_1 = arith.constant 0 : index
    %0 = vector.load %arg1[%c0, %c0_0, %c0_1] : memref<1x16x6xf32, #tpu.memory_space<vmem>>, vector<1x16x6xf32>
    %1 = vector.shape_cast %0 : vector<1x16x6xf32> to vector<16x6xf32>
    %c0_2 = arith.constant 0 : index
    %c0_3 = arith.constant 0 : index
    %2 = vector.load %arg2[%c0_2, %c0_3] : memref<1x6xf32, #tpu.memory_space<vmem>>, vector<1x6xf32>
    %3 = vector.broadcast %2 : vector<1x6xf32> to vector<16x6xf32>
    %4 = arith.mulf %1, %3 : vector<16x6xf32>
    %c0_4 = arith.constant 0 : index
    %c0_5 = arith.constant 0 : index
    %5 = vector.load %arg3[%c0_4, %c0_5] : memref<1x6xf32, #tpu.memory_space<vmem>>, vector<1x6xf32>
    %6 = vector.broadcast %5 : vector<1x6xf32> to vector<16x6xf32>
    %7 = arith.addf %4, %6 : vector<16x6xf32>
    %8 = vector.extract_strided_slice %7 {offsets = [0, 0], sizes = [16, 3], strides = [1, 1]} : vector<16x6xf32> to vector<16x3xf32>
    %cst = arith.constant dense<0.000000e+00> : vector<16x16xf32>
    %9 = tpu.matmul %8, %8, %cst {dimension_numbers = #tpu.dot_dimension_numbers<[1], [1], [0], [0], [0, 0, 1, 0], [], []>} : vector<16x3xf32>, vector<16x3xf32>, vector<16x16xf32> -> vector<16x16xf32>
    %10 = tpu.iota {dimensions = array<i32: 0>} : vector<16x16xi32>
    %11 = tpu.iota {dimensions = array<i32: 1>} : vector<16x16xi32>
    %12 = arith.cmpi eq, %10, %11 : vector<16x16xi32>
    %13 = arith.extui %12 : vector<16x16xi1> to vector<16x16xi32>
    %14 = arith.sitofp %13 : vector<16x16xi32> to vector<16x16xf32>
    %15 = arith.mulf %8, %8 : vector<16x3xf32>
    %cst_6 = arith.constant dense<0.000000e+00> : vector<16xf32>
    %16 = vector.multi_reduction <add>, %15, %cst_6 [1] : vector<16x3xf32> to vector<16xf32>
    %17 = vector.shape_cast %16 : vector<16xf32> to vector<16x1xf32>
    %18 = arith.mulf %9, %14 : vector<16x16xf32>
    %cst_7 = arith.constant dense<0.000000e+00> : vector<16xf32>
    %19 = vector.multi_reduction <add>, %18, %cst_7 [0] : vector<16x16xf32> to vector<16xf32>
    %20 = vector.shape_cast %19 : vector<16xf32> to vector<1x16xf32>
    %cst_8 = arith.constant 2.000000e+00 : f32
    %21 = vector.broadcast %cst_8 : f32 to vector<16x16xf32>
    %22 = arith.mulf %21, %9 : vector<16x16xf32>
    %23 = vector.broadcast %17 : vector<16x1xf32> to vector<16x16xf32>
    %24 = arith.subf %23, %22 : vector<16x16xf32>
    %25 = vector.broadcast %20 : vector<1x16xf32> to vector<16x16xf32>
    %26 = arith.addf %24, %25 : vector<16x16xf32>
    %cst_9 = arith.constant 0.000000e+00 : f32
    %27 = vector.broadcast %cst_9 : f32 to vector<16x16xf32>
    %28 = arith.subf %27, %26 : vector<16x16xf32>
    %29 = math.exp %28 : vector<16x16xf32>
    %cst_10 = arith.constant dense<0.000000e+00> : vector<16xf32>
    %30 = vector.multi_reduction <add>, %29, %cst_10 [1] : vector<16x16xf32> to vector<16xf32>
    %31 = vector.shape_cast %30 : vector<16xf32> to vector<16x1xf32>
    %cst_11 = arith.constant dense<0.000000e+00> : vector<16xf32>
    %32 = vector.multi_reduction <add>, %29, %cst_11 [0] : vector<16x16xf32> to vector<16xf32>
    %33 = vector.shape_cast %32 : vector<16xf32> to vector<1x16xf32>
    %34 = math.rsqrt %31 : vector<16x1xf32>
    %35 = math.rsqrt %33 : vector<1x16xf32>
    %36 = vector.broadcast %34 : vector<16x1xf32> to vector<16x16xf32>
    %37 = arith.mulf %29, %36 : vector<16x16xf32>
    %38 = vector.broadcast %35 : vector<1x16xf32> to vector<16x16xf32>
    %39 = arith.mulf %37, %38 : vector<16x16xf32>
    %40 = arith.subf %14, %39 : vector<16x16xf32>
    %c0_12 = arith.constant 0 : index
    %c0_13 = arith.constant 0 : index
    %c0_14 = arith.constant 0 : index
    %41 = vector.load %arg36[%c0_12, %c0_13, %c0_14] : memref<1x16x16xf32, #tpu.memory_space<vmem>>, vector<1x16x16xf32>
    %42 = vector.shape_cast %41 : vector<1x16x16xf32> to vector<16x16xf32>
    %43 = vector.shape_cast %40 : vector<16x16xf32> to vector<1x16x16xf32>
    tpu.vector_store %arg36[%c0_12, %c0_13, %c0_14], %43 {strides = array<i32>} : memref<1x16x16xf32, #tpu.memory_space<vmem>>, vector<1x16x16xf32>,
    %cst_15 = arith.constant dense<0.000000e+00> : vector<16x6xf32>
    %44 = tpu.matmul %40, %7, %cst_15 {dimension_numbers = #tpu.dot_dimension_numbers<[1], [0], [0], [1], [0, 0, 1, 1], [], []>} : vector<16x16xf32>, vector<16x6xf32>, vector<16x6xf32> -> vector<16x6xf32>
    %cst_16 = arith.constant dense<0.000000e+00> : vector<16x6xf32>
    %45 = tpu.matmul %40, %44, %cst_16 {dimension_numbers = #tpu.dot_dimension_numbers<[1], [0], [0], [1], [0, 0, 1, 1], [], []>} : vector<16x16xf32>, vector<16x6xf32>, vector<16x6xf32> -> vector<16x6xf32>
    %cst_17 = arith.constant 2.000000e+00 : f32
    %46 = vector.broadcast %cst_17 : f32 to vector<16x6xf32>
    %47 = arith.mulf %46, %45 : vector<16x6xf32>
    %48 = arith.subf %47, %7 : vector<16x6xf32>
    %49 = tpu.concatenate %7, %44, %48 in 1 : vector<16x6xf32>, vector<16x6xf32>, vector<16x6xf32> -> vector<16x18xf32>
    %c0_18 = arith.constant 0 : index
    %c0_19 = arith.constant 0 : index
    %50 = vector.load %arg4[%c0_18, %c0_19] : memref<18x16xf32, #tpu.memory_space<vmem>>, vector<18x16xf32>
    %cst_20 = arith.constant dense<0.000000e+00> : vector<16x16xf32>
    %51 = tpu.matmul %49, %50, %cst_20 {dimension_numbers = #tpu.dot_dimension_numbers<[1], [0], [0], [1], [0, 0, 1, 1], [], []>} : vector<16x18xf32>, vector<18x16xf32>, vector<16x16xf32> -> vector<16x16xf32>
    %c0_21 = arith.constant 0 : index
    %c0_22 = arith.constant 0 : index
    %52 = vector.load %arg5[%c0_21, %c0_22] : memref<1x16xf32, #tpu.memory_space<vmem>>, vector<1x16xf32>
    %53 = vector.broadcast %52 : vector<1x16xf32> to vector<16x16xf32>
    %54 = arith.addf %51, %53 : vector<16x16xf32>
    %c0_23 = arith.constant 0 : index
    %c0_24 = arith.constant 0 : index
    %c0_25 = arith.constant 0 : index
    %55 = vector.load %arg33[%c0_23, %c0_24, %c0_25] : memref<1x16x16xf32, #tpu.memory_space<vmem>>, vector<1x16x16xf32>
    %56 = vector.shape_cast %55 : vector<1x16x16xf32> to vector<16x16xf32>
    %57 = vector.shape_cast %54 : vector<16x16xf32> to vector<1x16x16xf32>
    tpu.vector_store %arg33[%c0_23, %c0_24, %c0_25], %57 {strides = array<i32>} : memref<1x16x16xf32, #tpu.memory_space<vmem>>, vector<1x16x16xf32>,
    %c0_26 = arith.constant 0 : index
    %c0_27 = arith.constant 0 : index
    %58 = vector.load %arg6[%c0_26, %c0_27] : memref<16x16xf32, #tpu.memory_space<vmem>>, vector<16x16xf32>
    %59 = arith.addf %54, %58 : vector<16x16xf32>
    %cst_28 = arith.constant 0.000000e+00 : f32
    %60 = vector.broadcast %cst_28 : f32 to vector<16x16xf32>
    %61 = arith.cmpf oge, %59, %60 : vector<16x16xf32>
    %cst_29 = arith.constant 0.00999999977 : f32
    %62 = vector.broadcast %cst_29 : f32 to vector<16x16xf32>
    %63 = arith.mulf %62, %59 : vector<16x16xf32>
    %64 = arith.select %61, %59, %63 : vector<16x16xi1>, vector<16x16xf32>
    %c0_30 = arith.constant 0 : index
    %c0_31 = arith.constant 0 : index
    %65 = vector.load %arg7[%c0_30, %c0_31] : memref<1x16xf32, #tpu.memory_space<vmem>>, vector<1x16xf32>
    %66 = vector.broadcast %65 : vector<1x16xf32> to vector<16x16xf32>
    %67 = arith.mulf %64, %66 : vector<16x16xf32>
    %c0_32 = arith.constant 0 : index
    %c0_33 = arith.constant 0 : index
    %68 = vector.load %arg8[%c0_32, %c0_33] : memref<1x16xf32, #tpu.memory_space<vmem>>, vector<1x16xf32>
    %69 = vector.broadcast %68 : vector<1x16xf32> to vector<16x16xf32>
    %70 = arith.addf %67, %69 : vector<16x16xf32>
    %cst_34 = arith.constant dense<0.000000e+00> : vector<16x16xf32>
    %71 = tpu.matmul %40, %70, %cst_34 {dimension_numbers = #tpu.dot_dimension_numbers<[1], [0], [0], [1], [0, 0, 1, 1], [], []>} : vector<16x16xf32>, vector<16x16xf32>, vector<16x16xf32> -> vector<16x16xf32>
    %cst_35 = arith.constant dense<0.000000e+00> : vector<16x16xf32>
    %72 = tpu.matmul %40, %71, %cst_35 {dimension_numbers = #tpu.dot_dimension_numbers<[1], [0], [0], [1], [0, 0, 1, 1], [], []>} : vector<16x16xf32>, vector<16x16xf32>, vector<16x16xf32> -> vector<16x16xf32>
    %cst_36 = arith.constant 2.000000e+00 : f32
    %73 = vector.broadcast %cst_36 : f32 to vector<16x16xf32>
    %74 = arith.mulf %73, %72 : vector<16x16xf32>
    %75 = arith.subf %74, %70 : vector<16x16xf32>
    %76 = tpu.concatenate %70, %71, %75 in 1 : vector<16x16xf32>, vector<16x16xf32>, vector<16x16xf32> -> vector<16x48xf32>
    %c0_37 = arith.constant 0 : index
    %c0_38 = arith.constant 0 : index
    %77 = vector.load %arg9[%c0_37, %c0_38] : memref<48x32xf32, #tpu.memory_space<vmem>>, vector<48x32xf32>
    %cst_39 = arith.constant dense<0.000000e+00> : vector<16x32xf32>
    %78 = tpu.matmul %76, %77, %cst_39 {dimension_numbers = #tpu.dot_dimension_numbers<[1], [0], [0], [1], [0, 0, 1, 1], [], []>} : vector<16x48xf32>, vector<48x32xf32>, vector<16x32xf32> -> vector<16x32xf32>
    %c0_40 = arith.constant 0 : index
    %c0_41 = arith.constant 0 : index
    %79 = vector.load %arg10[%c0_40, %c0_41] : memref<1x32xf32, #tpu.memory_space<vmem>>, vector<1x32xf32>
    %80 = vector.broadcast %79 : vector<1x32xf32> to vector<16x32xf32>
    %81 = arith.addf %78, %80 : vector<16x32xf32>
    %c0_42 = arith.constant 0 : index
    %c0_43 = arith.constant 0 : index
    %c0_44 = arith.constant 0 : index
    %82 = vector.load %arg34[%c0_42, %c0_43, %c0_44] : memref<1x16x32xf32, #tpu.memory_space<vmem>>, vector<1x16x32xf32>
    %83 = vector.shape_cast %82 : vector<1x16x32xf32> to vector<16x32xf32>
    %84 = vector.shape_cast %81 : vector<16x32xf32> to vector<1x16x32xf32>
    tpu.vector_store %arg34[%c0_42, %c0_43, %c0_44], %84 {strides = array<i32>} : memref<1x16x32xf32, #tpu.memory_space<vmem>>, vector<1x16x32xf32>,
    %c0_45 = arith.constant 0 : index
    %c0_46 = arith.constant 0 : index
    %85 = vector.load %arg11[%c0_45, %c0_46] : memref<16x32xf32, #tpu.memory_space<vmem>>, vector<16x32xf32>
    %86 = arith.addf %81, %85 : vector<16x32xf32>
    %cst_47 = arith.constant 0.000000e+00 : f32
    %87 = vector.broadcast %cst_47 : f32 to vector<16x32xf32>
    %88 = arith.cmpf oge, %86, %87 : vector<16x32xf32>
    %cst_48 = arith.constant 0.00999999977 : f32
    %89 = vector.broadcast %cst_48 : f32 to vector<16x32xf32>
    %90 = arith.mulf %89, %86 : vector<16x32xf32>
    %91 = arith.select %88, %86, %90 : vector<16x32xi1>, vector<16x32xf32>
    %c0_49 = arith.constant 0 : index
    %c0_50 = arith.constant 0 : index
    %92 = vector.load %arg12[%c0_49, %c0_50] : memref<1x32xf32, #tpu.memory_space<vmem>>, vector<1x32xf32>
    %93 = vector.broadcast %92 : vector<1x32xf32> to vector<16x32xf32>
    %94 = arith.mulf %91, %93 : vector<16x32xf32>
    %c0_51 = arith.constant 0 : index
    %c0_52 = arith.constant 0 : index
    %95 = vector.load %arg13[%c0_51, %c0_52] : memref<1x32xf32, #tpu.memory_space<vmem>>, vector<1x32xf32>
    %96 = vector.broadcast %95 : vector<1x32xf32> to vector<16x32xf32>
    %97 = arith.addf %94, %96 : vector<16x32xf32>
    %cst_53 = arith.constant dense<0.000000e+00> : vector<16x32xf32>
    %98 = tpu.matmul %40, %97, %cst_53 {dimension_numbers = #tpu.dot_dimension_numbers<[1], [0], [0], [1], [0, 0, 1, 1], [], []>} : vector<16x16xf32>, vector<16x32xf32>, vector<16x32xf32> -> vector<16x32xf32>
    %cst_54 = arith.constant dense<0.000000e+00> : vector<16x32xf32>
    %99 = tpu.matmul %40, %98, %cst_54 {dimension_numbers = #tpu.dot_dimension_numbers<[1], [0], [0], [1], [0, 0, 1, 1], [], []>} : vector<16x16xf32>, vector<16x32xf32>, vector<16x32xf32> -> vector<16x32xf32>
    %cst_55 = arith.constant 2.000000e+00 : f32
    %100 = vector.broadcast %cst_55 : f32 to vector<16x32xf32>
    %101 = arith.mulf %100, %99 : vector<16x32xf32>
    %102 = arith.subf %101, %97 : vector<16x32xf32>
    %103 = tpu.concatenate %97, %98, %102 in 1 : vector<16x32xf32>, vector<16x32xf32>, vector<16x32xf32> -> vector<16x96xf32>
    %c0_56 = arith.constant 0 : index
    %c0_57 = arith.constant 0 : index
    %104 = vector.load %arg14[%c0_56, %c0_57] : memref<96x32xf32, #tpu.memory_space<vmem>>, vector<96x32xf32>
    %cst_58 = arith.constant dense<0.000000e+00> : vector<16x32xf32>
    %105 = tpu.matmul %103, %104, %cst_58 {dimension_numbers = #tpu.dot_dimension_numbers<[1], [0], [0], [1], [0, 0, 1, 1], [], []>} : vector<16x96xf32>, vector<96x32xf32>, vector<16x32xf32> -> vector<16x32xf32>
    %c0_59 = arith.constant 0 : index
    %c0_60 = arith.constant 0 : index
    %106 = vector.load %arg15[%c0_59, %c0_60] : memref<1x32xf32, #tpu.memory_space<vmem>>, vector<1x32xf32>
    %107 = vector.broadcast %106 : vector<1x32xf32> to vector<16x32xf32>
    %108 = arith.addf %105, %107 : vector<16x32xf32>
    %c0_61 = arith.constant 0 : index
    %c0_62 = arith.constant 0 : index
    %c0_63 = arith.constant 0 : index
    %109 = vector.load %arg35[%c0_61, %c0_62, %c0_63] : memref<1x16x32xf32, #tpu.memory_space<vmem>>, vector<1x16x32xf32>
    %110 = vector.shape_cast %109 : vector<1x16x32xf32> to vector<16x32xf32>
    %111 = vector.shape_cast %108 : vector<16x32xf32> to vector<1x16x32xf32>
    tpu.vector_store %arg35[%c0_61, %c0_62, %c0_63], %111 {strides = array<i32>} : memref<1x16x32xf32, #tpu.memory_space<vmem>>, vector<1x16x32xf32>,
    %c0_64 = arith.constant 0 : index
    %c0_65 = arith.constant 0 : index
    %112 = vector.load %arg16[%c0_64, %c0_65] : memref<16x32xf32, #tpu.memory_space<vmem>>, vector<16x32xf32>
    %113 = arith.addf %108, %112 : vector<16x32xf32>
    %cst_66 = arith.constant 0.000000e+00 : f32
    %114 = vector.broadcast %cst_66 : f32 to vector<16x32xf32>
    %115 = arith.cmpf oge, %113, %114 : vector<16x32xf32>
    %cst_67 = arith.constant 0.00999999977 : f32
    %116 = vector.broadcast %cst_67 : f32 to vector<16x32xf32>
    %117 = arith.mulf %116, %113 : vector<16x32xf32>
    %118 = arith.select %115, %113, %117 : vector<16x32xi1>, vector<16x32xf32>
    %c0_68 = arith.constant 0 : index
    %c0_69 = arith.constant 0 : index
    %119 = vector.load %arg17[%c0_68, %c0_69] : memref<1x32xf32, #tpu.memory_space<vmem>>, vector<1x32xf32>
    %120 = vector.broadcast %119 : vector<1x32xf32> to vector<16x32xf32>
    %121 = arith.mulf %118, %120 : vector<16x32xf32>
    %c0_70 = arith.constant 0 : index
    %c0_71 = arith.constant 0 : index
    %122 = vector.load %arg18[%c0_70, %c0_71] : memref<1x32xf32, #tpu.memory_space<vmem>>, vector<1x32xf32>
    %123 = vector.broadcast %122 : vector<1x32xf32> to vector<16x32xf32>
    %124 = arith.addf %121, %123 : vector<16x32xf32>
    %c0_72 = arith.constant 0 : index
    %c0_73 = arith.constant 0 : index
    %125 = vector.load %arg19[%c0_72, %c0_73] : memref<32x32xf32, #tpu.memory_space<vmem>>, vector<32x32xf32>
    %cst_74 = arith.constant dense<0.000000e+00> : vector<16x32xf32>
    %126 = tpu.matmul %124, %125, %cst_74 {dimension_numbers = #tpu.dot_dimension_numbers<[1], [0], [0], [1], [0, 0, 1, 1], [], []>} : vector<16x32xf32>, vector<32x32xf32>, vector<16x32xf32> -> vector<16x32xf32>
    %c0_75 = arith.constant 0 : index
    %c0_76 = arith.constant 0 : index
    %127 = vector.load %arg20[%c0_75, %c0_76] : memref<16x32xf32, #tpu.memory_space<vmem>>, vector<16x32xf32>
    %128 = arith.addf %126, %127 : vector<16x32xf32>
    %cst_77 = arith.constant 0.000000e+00 : f32
    %129 = vector.broadcast %cst_77 : f32 to vector<16x32xf32>
    %130 = arith.maximumf %128, %129 : vector<16x32xf32>
    %c0_78 = arith.constant 0 : index
    %c0_79 = arith.constant 0 : index
    %131 = vector.load %arg21[%c0_78, %c0_79] : memref<1x32xf32, #tpu.memory_space<vmem>>, vector<1x32xf32>
    %132 = vector.broadcast %131 : vector<1x32xf32> to vector<16x32xf32>
    %133 = arith.mulf %130, %132 : vector<16x32xf32>
    %c0_80 = arith.constant 0 : index
    %c0_81 = arith.constant 0 : index
    %134 = vector.load %arg22[%c0_80, %c0_81] : memref<1x32xf32, #tpu.memory_space<vmem>>, vector<1x32xf32>
    %135 = vector.broadcast %134 : vector<1x32xf32> to vector<16x32xf32>
    %136 = arith.addf %133, %135 : vector<16x32xf32>
    %c0_82 = arith.constant 0 : index
    %c0_83 = arith.constant 0 : index
    %137 = vector.load %arg23[%c0_82, %c0_83] : memref<32x16xf32, #tpu.memory_space<vmem>>, vector<32x16xf32>
    %cst_84 = arith.constant dense<0.000000e+00> : vector<16x16xf32>
    %138 = tpu.matmul %136, %137, %cst_84 {dimension_numbers = #tpu.dot_dimension_numbers<[1], [0], [0], [1], [0, 0, 1, 1], [], []>} : vector<16x32xf32>, vector<32x16xf32>, vector<16x16xf32> -> vector<16x16xf32>
    %c0_85 = arith.constant 0 : index
    %c0_86 = arith.constant 0 : index
    %139 = vector.load %arg24[%c0_85, %c0_86] : memref<32x16xf32, #tpu.memory_space<vmem>>, vector<32x16xf32>
    %cst_87 = arith.constant dense<0.000000e+00> : vector<16x16xf32>
    %140 = tpu.matmul %97, %139, %cst_87 {dimension_numbers = #tpu.dot_dimension_numbers<[1], [0], [0], [1], [0, 0, 1, 1], [], []>} : vector<16x32xf32>, vector<32x16xf32>, vector<16x16xf32> -> vector<16x16xf32>
    %141 = arith.addf %138, %140 : vector<16x16xf32>
    %c0_88 = arith.constant 0 : index
    %c0_89 = arith.constant 0 : index
    %142 = vector.load %arg25[%c0_88, %c0_89] : memref<16x16xf32, #tpu.memory_space<vmem>>, vector<16x16xf32>
    %143 = arith.addf %141, %142 : vector<16x16xf32>
    %cst_90 = arith.constant 0.000000e+00 : f32
    %144 = vector.broadcast %cst_90 : f32 to vector<16x16xf32>
    %145 = arith.maximumf %143, %144 : vector<16x16xf32>
    %c0_91 = arith.constant 0 : index
    %c0_92 = arith.constant 0 : index
    %146 = vector.load %arg26[%c0_91, %c0_92] : memref<1x16xf32, #tpu.memory_space<vmem>>, vector<1x16xf32>
    %147 = vector.broadcast %146 : vector<1x16xf32> to vector<16x16xf32>
    %148 = arith.mulf %145, %147 : vector<16x16xf32>
    %c0_93 = arith.constant 0 : index
    %c0_94 = arith.constant 0 : index
    %149 = vector.load %arg27[%c0_93, %c0_94] : memref<1x16xf32, #tpu.memory_space<vmem>>, vector<1x16xf32>
    %150 = vector.broadcast %149 : vector<1x16xf32> to vector<16x16xf32>
    %151 = arith.addf %148, %150 : vector<16x16xf32>
    %c0_95 = arith.constant 0 : index
    %c0_96 = arith.constant 0 : index
    %152 = vector.load %arg28[%c0_95, %c0_96] : memref<16x8xf32, #tpu.memory_space<vmem>>, vector<16x8xf32>
    %cst_97 = arith.constant dense<0.000000e+00> : vector<16x8xf32>
    %153 = tpu.matmul %151, %152, %cst_97 {dimension_numbers = #tpu.dot_dimension_numbers<[1], [0], [0], [1], [0, 0, 1, 1], [], []>} : vector<16x16xf32>, vector<16x8xf32>, vector<16x8xf32> -> vector<16x8xf32>
    %c0_98 = arith.constant 0 : index
    %c0_99 = arith.constant 0 : index
    %154 = vector.load %arg29[%c0_98, %c0_99] : memref<16x8xf32, #tpu.memory_space<vmem>>, vector<16x8xf32>
    %155 = arith.addf %153, %154 : vector<16x8xf32>
    %cst_100 = arith.constant 0.000000e+00 : f32
    %156 = vector.broadcast %cst_100 : f32 to vector<16x8xf32>
    %157 = arith.maximumf %155, %156 : vector<16x8xf32>
    %c0_101 = arith.constant 0 : index
    %c0_102 = arith.constant 0 : index
    %158 = vector.load %arg30[%c0_101, %c0_102] : memref<1x8xf32, #tpu.memory_space<vmem>>, vector<1x8xf32>
    %159 = vector.broadcast %158 : vector<1x8xf32> to vector<16x8xf32>
    %160 = arith.mulf %157, %159 : vector<16x8xf32>
    %c0_103 = arith.constant 0 : index
    %c0_104 = arith.constant 0 : index
    %161 = vector.load %arg31[%c0_103, %c0_104] : memref<1x8xf32, #tpu.memory_space<vmem>>, vector<1x8xf32>
    %162 = vector.broadcast %161 : vector<1x8xf32> to vector<16x8xf32>
    %163 = arith.addf %160, %162 : vector<16x8xf32>
    %c0_105 = arith.constant 0 : index
    %c0_106 = arith.constant 0 : index
    %c0_107 = arith.constant 0 : index
    %164 = vector.load %arg32[%c0_105, %c0_106, %c0_107] : memref<1x16x8xf32, #tpu.memory_space<vmem>>, vector<1x16x8xf32>
    %165 = vector.shape_cast %164 : vector<1x16x8xf32> to vector<16x8xf32>
    %166 = vector.shape_cast %163 : vector<16x8xf32> to vector<1x16x8xf32>
    tpu.vector_store %arg32[%c0_105, %c0_106, %c0_107], %166 {strides = array<i32>} : memref<1x16x8xf32, #tpu.memory_space<vmem>>, vector<1x16x8xf32>,
    return
  }
  func.func @transform_0(%arg0: i32) -> (i32, i32, i32) {
    %c0_i32 = arith.constant 0 : i32
    %c0_i32_0 = arith.constant 0 : i32
    %c0_i32_1 = arith.constant 0 : i32
    return %arg0, %c0_i32, %c0_i32_0 : i32, i32, i32
  }
  func.func @transform_1(%arg0: i32) -> (i32, i32) {
    %c0_i32 = arith.constant 0 : i32
    %c0_i32_0 = arith.constant 0 : i32
    %c0_i32_1 = arith.constant 0 : i32
    return %c0_i32, %c0_i32_0 : i32, i32
  }
  func.func @transform_2(%arg0: i32) -> (i32, i32) {
    %c0_i32 = arith.constant 0 : i32
    %c0_i32_0 = arith.constant 0 : i32
    %c0_i32_1 = arith.constant 0 : i32
    return %c0_i32, %c0_i32_0 : i32, i32
  }
  func.func @transform_3(%arg0: i32) -> (i32, i32) {
    %c0_i32 = arith.constant 0 : i32
    %c0_i32_0 = arith.constant 0 : i32
    %c0_i32_1 = arith.constant 0 : i32
    return %c0_i32, %c0_i32_0 : i32, i32
  }
  func.func @transform_4(%arg0: i32) -> (i32, i32) {
    %c0_i32 = arith.constant 0 : i32
    %c0_i32_0 = arith.constant 0 : i32
    %c0_i32_1 = arith.constant 0 : i32
    return %c0_i32, %c0_i32_0 : i32, i32
  }
  func.func @transform_5(%arg0: i32) -> (i32, i32) {
    %c0_i32 = arith.constant 0 : i32
    %c0_i32_0 = arith.constant 0 : i32
    %c0_i32_1 = arith.constant 0 : i32
    return %c0_i32, %c0_i32_0 : i32, i32
  }
  func.func @transform_6(%arg0: i32) -> (i32, i32) {
    %c0_i32 = arith.constant 0 : i32
    %c0_i32_0 = arith.constant 0 : i32
    %c0_i32_1 = arith.constant 0 : i32
    return %c0_i32, %c0_i32_0 : i32, i32
  }
  func.func @transform_7(%arg0: i32) -> (i32, i32) {
    %c0_i32 = arith.constant 0 : i32
    %c0_i32_0 = arith.constant 0 : i32
    %c0_i32_1 = arith.constant 0 : i32
    return %c0_i32, %c0_i32_0 : i32, i32
  }
  func.func @transform_8(%arg0: i32) -> (i32, i32) {
    %c0_i32 = arith.constant 0 : i32
    %c0_i32_0 = arith.constant 0 : i32
    %c0_i32_1 = arith.constant 0 : i32
    return %c0_i32, %c0_i32_0 : i32, i32
  }
  func.func @transform_9(%arg0: i32) -> (i32, i32) {
    %c0_i32 = arith.constant 0 : i32
    %c0_i32_0 = arith.constant 0 : i32
    %c0_i32_1 = arith.constant 0 : i32
    return %c0_i32, %c0_i32_0 : i32, i32
  }
  func.func @transform_10(%arg0: i32) -> (i32, i32) {
    %c0_i32 = arith.constant 0 : i32
    %c0_i32_0 = arith.constant 0 : i32
    %c0_i32_1 = arith.constant 0 : i32
    return %c0_i32, %c0_i32_0 : i32, i32
  }
  func.func @transform_11(%arg0: i32) -> (i32, i32) {
    %c0_i32 = arith.constant 0 : i32
    %c0_i32_0 = arith.constant 0 : i32
    %c0_i32_1 = arith.constant 0 : i32
    return %c0_i32, %c0_i32_0 : i32, i32
  }
  func.func @transform_12(%arg0: i32) -> (i32, i32) {
    %c0_i32 = arith.constant 0 : i32
    %c0_i32_0 = arith.constant 0 : i32
    %c0_i32_1 = arith.constant 0 : i32
    return %c0_i32, %c0_i32_0 : i32, i32
  }
  func.func @transform_13(%arg0: i32) -> (i32, i32) {
    %c0_i32 = arith.constant 0 : i32
    %c0_i32_0 = arith.constant 0 : i32
    %c0_i32_1 = arith.constant 0 : i32
    return %c0_i32, %c0_i32_0 : i32, i32
  }
  func.func @transform_14(%arg0: i32) -> (i32, i32) {
    %c0_i32 = arith.constant 0 : i32
    %c0_i32_0 = arith.constant 0 : i32
    %c0_i32_1 = arith.constant 0 : i32
    return %c0_i32, %c0_i32_0 : i32, i32
  }
  func.func @transform_15(%arg0: i32) -> (i32, i32) {
    %c0_i32 = arith.constant 0 : i32
    %c0_i32_0 = arith.constant 0 : i32
    %c0_i32_1 = arith.constant 0 : i32
    return %c0_i32, %c0_i32_0 : i32, i32
  }
  func.func @transform_16(%arg0: i32) -> (i32, i32) {
    %c0_i32 = arith.constant 0 : i32
    %c0_i32_0 = arith.constant 0 : i32
    %c0_i32_1 = arith.constant 0 : i32
    return %c0_i32, %c0_i32_0 : i32, i32
  }
  func.func @transform_17(%arg0: i32) -> (i32, i32) {
    %c0_i32 = arith.constant 0 : i32
    %c0_i32_0 = arith.constant 0 : i32
    %c0_i32_1 = arith.constant 0 : i32
    return %c0_i32, %c0_i32_0 : i32, i32
  }
  func.func @transform_18(%arg0: i32) -> (i32, i32) {
    %c0_i32 = arith.constant 0 : i32
    %c0_i32_0 = arith.constant 0 : i32
    %c0_i32_1 = arith.constant 0 : i32
    return %c0_i32, %c0_i32_0 : i32, i32
  }
  func.func @transform_19(%arg0: i32) -> (i32, i32) {
    %c0_i32 = arith.constant 0 : i32
    %c0_i32_0 = arith.constant 0 : i32
    %c0_i32_1 = arith.constant 0 : i32
    return %c0_i32, %c0_i32_0 : i32, i32
  }
  func.func @transform_20(%arg0: i32) -> (i32, i32) {
    %c0_i32 = arith.constant 0 : i32
    %c0_i32_0 = arith.constant 0 : i32
    %c0_i32_1 = arith.constant 0 : i32
    return %c0_i32, %c0_i32_0 : i32, i32
  }
  func.func @transform_21(%arg0: i32) -> (i32, i32) {
    %c0_i32 = arith.constant 0 : i32
    %c0_i32_0 = arith.constant 0 : i32
    %c0_i32_1 = arith.constant 0 : i32
    return %c0_i32, %c0_i32_0 : i32, i32
  }
  func.func @transform_22(%arg0: i32) -> (i32, i32) {
    %c0_i32 = arith.constant 0 : i32
    %c0_i32_0 = arith.constant 0 : i32
    %c0_i32_1 = arith.constant 0 : i32
    return %c0_i32, %c0_i32_0 : i32, i32
  }
  func.func @transform_23(%arg0: i32) -> (i32, i32) {
    %c0_i32 = arith.constant 0 : i32
    %c0_i32_0 = arith.constant 0 : i32
    %c0_i32_1 = arith.constant 0 : i32
    return %c0_i32, %c0_i32_0 : i32, i32
  }
  func.func @transform_24(%arg0: i32) -> (i32, i32) {
    %c0_i32 = arith.constant 0 : i32
    %c0_i32_0 = arith.constant 0 : i32
    %c0_i32_1 = arith.constant 0 : i32
    return %c0_i32, %c0_i32_0 : i32, i32
  }
  func.func @transform_25(%arg0: i32) -> (i32, i32) {
    %c0_i32 = arith.constant 0 : i32
    %c0_i32_0 = arith.constant 0 : i32
    %c0_i32_1 = arith.constant 0 : i32
    return %c0_i32, %c0_i32_0 : i32, i32
  }
  func.func @transform_26(%arg0: i32) -> (i32, i32) {
    %c0_i32 = arith.constant 0 : i32
    %c0_i32_0 = arith.constant 0 : i32
    %c0_i32_1 = arith.constant 0 : i32
    return %c0_i32, %c0_i32_0 : i32, i32
  }
  func.func @transform_27(%arg0: i32) -> (i32, i32) {
    %c0_i32 = arith.constant 0 : i32
    %c0_i32_0 = arith.constant 0 : i32
    %c0_i32_1 = arith.constant 0 : i32
    return %c0_i32, %c0_i32_0 : i32, i32
  }
  func.func @transform_28(%arg0: i32) -> (i32, i32) {
    %c0_i32 = arith.constant 0 : i32
    %c0_i32_0 = arith.constant 0 : i32
    %c0_i32_1 = arith.constant 0 : i32
    return %c0_i32, %c0_i32_0 : i32, i32
  }
  func.func @transform_29(%arg0: i32) -> (i32, i32) {
    %c0_i32 = arith.constant 0 : i32
    %c0_i32_0 = arith.constant 0 : i32
    %c0_i32_1 = arith.constant 0 : i32
    return %c0_i32, %c0_i32_0 : i32, i32
  }
  func.func @transform_30(%arg0: i32) -> (i32, i32) {
    %c0_i32 = arith.constant 0 : i32
    %c0_i32_0 = arith.constant 0 : i32
    %c0_i32_1 = arith.constant 0 : i32
    return %c0_i32, %c0_i32_0 : i32, i32
  }
  func.func @transform_31(%arg0: i32) -> (i32, i32, i32) {
    %c0_i32 = arith.constant 0 : i32
    %c0_i32_0 = arith.constant 0 : i32
    %c0_i32_1 = arith.constant 0 : i32
    return %arg0, %c0_i32, %c0_i32_0 : i32, i32, i32
  }
  func.func @transform_32(%arg0: i32) -> (i32, i32, i32) {
    %c0_i32 = arith.constant 0 : i32
    %c0_i32_0 = arith.constant 0 : i32
    %c0_i32_1 = arith.constant 0 : i32
    return %arg0, %c0_i32, %c0_i32_0 : i32, i32, i32
  }
  func.func @transform_33(%arg0: i32) -> (i32, i32, i32) {
    %c0_i32 = arith.constant 0 : i32
    %c0_i32_0 = arith.constant 0 : i32
    %c0_i32_1 = arith.constant 0 : i32
    return %arg0, %c0_i32, %c0_i32_0 : i32, i32, i32
  }
  func.func @transform_34(%arg0: i32) -> (i32, i32, i32) {
    %c0_i32 = arith.constant 0 : i32
    %c0_i32_0 = arith.constant 0 : i32
    %c0_i32_1 = arith.constant 0 : i32
    return %arg0, %c0_i32, %c0_i32_0 : i32, i32, i32
  }
  func.func @transform_35(%arg0: i32) -> (i32, i32, i32) {
    %c0_i32 = arith.constant 0 : i32
    %c0_i32_0 = arith.constant 0 : i32
    %c0_i32_1 = arith.constant 0 : i32
    return %arg0, %c0_i32, %c0_i32_0 : i32, i32, i32
  }
}

</mosaic_0001>

<bundles_post_ra>
// kernel: tpu_custom_call.1
= control target key start
LH: loop header
LB: loop body
LE: loop exit
PB: predicated region body
PF: predicated region fallthrough
CT: control target
= control target key end

     0   :  { %s3563_s6 = smov 1   ;;  %s3564_s10 = smov 2   ;;  %s4181_s0 = inlined_call_operand.smem [shape: u32[36], index: -1, kind: input, shape index: {}] }
   0x1   :  { %s3618_s5 = sld [smem:[%s4181_s0]]   ;;  %s3565_s14 = smov 3  }
   0x2   :  { %s3623_s9 = sld [smem:[%s4181_s0 + %s3563_s6]]   ;;  %s3566_s18 = smov 4  }
   0x3   :  { %s3628_s13 = sld [smem:[%s4181_s0 + %s3564_s10]]   ;;  %s3567_s22 = smov 5  }
   0x4   :  { %s3633_s17 = sld [smem:[%s4181_s0 + %s3565_s14]]   ;;  %s3568_s26 = smov 6  }
   0x5   :  { %s3638_s21 = sld [smem:[%s4181_s0 + %s3566_s18]]   ;;  %s3569_s30 = smov 7  }
   0x6   :  { %s3643_s25 = sld [smem:[%s4181_s0 + %s3567_s22]]   ;;  %s3570_s4 = smov 8  }
   0x7   :  { %4206 = sst [smem:[#allocation12_spill]] %s3618_s5  ;;  %s3571_s10 = smov 9  }
   0x8   :  { %4207 = sst [smem:[#allocation13_spill]] %s3623_s9  ;;  %s3572_s15 = smov 10  }
   0x9   :  { %4208 = sst [smem:[#allocation14_spill]] %s3628_s13  ;;  %s3573_s20 = smov 11  }
   0xa   :  { %4209 = sst [smem:[#allocation15_spill]] %s3633_s17  ;;  %s3575_s1 = smov 13  }
   0xb   :  { %4210 = sst [smem:[#allocation16_spill]] %s3638_s21  ;;  %s3576_s7 = smov 14  }
   0xc   :  { %s3648_s29 = sld [smem:[%s4181_s0 + %s3568_s26]]   ;;  %s3574_s26 = smov 12  }
   0xd   :  { %s3653_s3 = sld [smem:[%s4181_s0 + %s3569_s30]]   ;;  %s3578_s22 = smov 16  }
   0xe   :  { %s3658_s8 = sld [smem:[%s4181_s0 + %s3570_s4]]   ;;  %s3579_s28 = smov 17  }
   0xf   :  { %s3663_s14 = sld [smem:[%s4181_s0 + %s3571_s10]]  }
  0x10   :  { %s3668_s19 = sld [smem:[%s4181_s0 + %s3572_s15]]   ;;  %s3577_s15 = smov 15  }
  0x11   :  { %s3673_s24 = sld [smem:[%s4181_s0 + %s3573_s20]]  }
  0x12   :  { %s3678_s30 = sld [smem:[%s4181_s0 + %s3574_s26]]  }
  0x13   :  { %4211 = sst [smem:[#allocation17_spill]] %s3653_s3 }
  0x14   :  { %4212 = sst [smem:[#allocation18_spill]] %s3658_s8 }
  0x15   :  { %4213 = sst [smem:[#allocation19_spill]] %s3663_s14 }
  0x16   :  { %4214 = sst [smem:[#allocation20_spill]] %s3668_s19 }
  0x17   :  { %4215 = sst [smem:[#allocation21_spill]] %s3673_s24 }
  0x18   :  { %s3683_s6 = sld [smem:[%s4181_s0 + %s3575_s1]]  }
  0x19   :  { %s3688_s12 = sld [smem:[%s4181_s0 + %s3576_s7]]   ;;  %s3580_s7 = smov 18  }
  0x1a   :  { %s3693_s20 = sld [smem:[%s4181_s0 + %s3577_s15]]   ;;  %s3581_s15 = smov 19  }
  0x1b   :  { %s3698_s27 = sld [smem:[%s4181_s0 + %s3578_s22]]   ;;  %s3582_s22 = smov 20  }
  0x1c   :  { %s3703_s4 = sld [smem:[%s4181_s0 + %s3579_s28]]   ;;  %s3583_s28 = smov 21  }
  0x1e   :  { %4216 = sst [smem:[#allocation22_spill]] %s3683_s6 }
  0x1f   :  { %4217 = sst [smem:[#allocation23_spill]] %s3688_s12 }
  0x20   :  { %4218 = sst [smem:[#allocation24_spill]] %s3693_s20 }
  0x21   :  { %4219 = sst [smem:[#allocation25_spill]] %s3698_s27 }
  0x22   :  { %4220 = sst [smem:[#allocation26_spill]] %s3703_s4 }
  0x23   :  { %s3708_s12 = sld [smem:[%s4181_s0 + %s3580_s7]]   ;;  %s3584_s7 = smov 22  }
  0x24   :  { %s3713_s20 = sld [smem:[%s4181_s0 + %s3581_s15]]   ;;  %s3585_s15 = smov 23  }
  0x25   :  { %s3718_s27 = sld [smem:[%s4181_s0 + %s3582_s22]]   ;;  %s3586_s22 = smov 24  }
  0x26   :  { %s3723_s4 = sld [smem:[%s4181_s0 + %s3583_s28]]   ;;  %s3587_s28 = smov 25  }
  0x29   :  { %4221 = sst [smem:[#allocation27_spill]] %s3708_s12 }
  0x2a   :  { %4222 = sst [smem:[#allocation28_spill]] %s3713_s20 }
  0x2b   :  { %4223 = sst [smem:[#allocation29_spill]] %s3718_s27 }
  0x2c   :  { %4224 = sst [smem:[#allocation30_spill]] %s3723_s4 }
  0x2d   :  { %s3728_s12 = sld [smem:[%s4181_s0 + %s3584_s7]]   ;;  %s3588_s7 = smov 26  }
  0x2e   :  { %s3733_s20 = sld [smem:[%s4181_s0 + %s3585_s15]]   ;;  %s3589_s15 = smov 27  }
  0x2f   :  { %s3738_s27 = sld [smem:[%s4181_s0 + %s3586_s22]]   ;;  %s3590_s22 = smov 28  }
  0x30   :  { %s3743_s4 = sld [smem:[%s4181_s0 + %s3587_s28]]   ;;  %s3591_s28 = smov 29  }
  0x33   :  { %4225 = sst [smem:[#allocation31_spill]] %s3728_s12 }
  0x34   :  { %4226 = sst [smem:[#allocation32_spill]] %s3733_s20 }
  0x35   :  { %4227 = sst [smem:[#allocation33_spill]] %s3738_s27 }
  0x36   :  { %4228 = sst [smem:[#allocation34_spill]] %s3743_s4 }
  0x37   :  { %s3748_s12 = sld [smem:[%s4181_s0 + %s3588_s7]]   ;;  %s3592_s7 = smov 30  }
  0x38   :  { %s3753_s20 = sld [smem:[%s4181_s0 + %s3589_s15]]   ;;  %s3593_s15 = smov 31  }
  0x39   :  { %s3758_s27 = sld [smem:[%s4181_s0 + %s3590_s22]]   ;;  %s3594_s22 = smov 32  }
  0x3a   :  { %s3763_s4 = sld [smem:[%s4181_s0 + %s3591_s28]]   ;;  %s3595_s28 = smov 33  }
  0x3d   :  { %4229 = sst [smem:[#allocation35_spill]] %s3748_s12 }
  0x3e   :  { %4230 = sst [smem:[#allocation36_spill]] %s3753_s20 }
  0x3f   :  { %4231 = sst [smem:[#allocation37_spill]] %s3758_s27 }
  0x40   :  { %4232 = sst [smem:[#allocation38_spill]] %s3763_s4 }
  0x41   :  { %s3768_s12 = sld [smem:[%s4181_s0 + %s3592_s7]]   ;;  %s3596_s7 = smov 34  }
  0x42   :  { %s3773_s20 = sld [smem:[%s4181_s0 + %s3593_s15]]   ;;  %s3597_s15 = smov 35  }
  0x43   :  { %s3778_s27 = sld [smem:[%s4181_s0 + %s3594_s22]]  }
  0x44   :  { %s3783_s4 = sld [smem:[%s4181_s0 + %s3595_s28]]  }
  0x47   :  { %4233 = sst [smem:[#allocation39_spill]] %s3768_s12 }
  0x48   :  { %4234 = sst [smem:[#allocation40_spill]] %s3773_s20 }
  0x49   :  { %s3788_s12 = sld [smem:[%s4181_s0 + %s3596_s7]]  }
  0x4a   :  { %4235 = sst [smem:[#allocation41_spill]] %s3783_s4 }
  0x4b   :  { %s3793_s20 = sld [smem:[%s4181_s0 + %s3597_s15]]  }
  0x4c   :  { %77 = vsyncpa [#allocation3], 0 }
  0x4d   :  { %79 = vsyncpa [#allocation3 + $0x1], 0 }
  0x4e   :  { %80 = vsyncpa [#allocation5], 0 }
  0x4f   :  { %82 = vsyncpa [#allocation5 + $0x1], 0 }
  0x50   :  { %83 = vsyncpa [#allocation8], 0 }
  0x51   :  { %85 = vsyncpa [#allocation8 + $0x1], 0  ;;  %s3795_s22 = smov 0   ;;  %s3797_s23 = smov 0  }
  0x52   :  { %s3799_s26 = smov 0   ;;  %s3801_s28 = smov 0  }
  0x53 LB: > { %s4236_s4 = sld [smem:[#allocation41_spill]]  ;;  %s4237_s19 = sld [smem:[#allocation20_spill]]  ;;  %s3549_s22 = sphi %s3795_s22, %s4271_s22   ;;  %s3561_s28 = sphi %s3801_s28, %s4274_s28   ;;  %s3557_s26 = sphi %s3799_s26, %s4273_s26   ;;  %s3553_s23 = sphi %s3797_s23, %s4272_s23  }
  0x54   : > { %s4238_s17 = sld [smem:[#allocation15_spill]]  ;;  %s4239_s6 = sld [smem:[#allocation22_spill]] }
  0x55   : > { %s4240_s8 = sld [smem:[#allocation18_spill]]  ;;  %s3816_s0 = sadd.s32 4294967295, %s3561_s28  }
  0x56   : > { %s4190_s1 = sadd.s32 4294967294, %s3561_s28   ;;  %s3820_s2 = sadd.s32 1, %s3561_s28  }
  0x57   : > { %s780_s7 = sadd.s32 1, %s3557_s26  ;;  %s777_s10 = ssub.s32 %s3561_s28, %s3820_s2 }
  0x58   : > { %p790_p0 = scmp.ne.s32.totalorder %s3557_s26, %s3553_s23  ;;  %p778_p1 = scmp.eq.s32.totalorder %s777_s10, 0 }
  0x59   : > { %p791_p2 = scmp.eq.s32.totalorder %s3816_s0, 1  ;;  %p796_p3 = scmp.ne.s32.totalorder %s3553_s23, %s3549_s22 }
  0x5a   : > { %p797_p4 = scmp.eq.s32.totalorder %s4190_s1, 1  ;;  %p2904_p7 = scmp.ge.s32.totalorder %s3561_s28, 1 }
  0x5b   : > { %s3833_s11 = scalar_select %p778_p1, %s3557_s26, %s780_s7  }
  0x5c   : > { %p3835_p5 = por %p791_p2, %p790_p0  ;;  %p3839_p6 = por %p797_p4, %p796_p3 }
  0x5d   : > { %p991_p8 = scmp.lt.s32.totalorder %s3561_s28, 3 }
  0x5f   : > { %p992_p9 = pnand %p2904_p7, %p991_p8 }
  0x60   : > { %s4243_s9 = sld [smem:[#allocation13_spill]] (!%p992_p9)  ;;  %s4244_s5 = sld [smem:[#allocation12_spill]] (!%p992_p9)  ;;  %vm1129_vm0 = vcmask (!%p992_p9), 23552   ;;  %v1211_v13 = vlaneseq (!%p992_p9)  ;;  %v3598_v17 = vmov (!%p992_p9), 0.0   ;;  %vm1232_vm4 = vcmask (!%p992_p9), 130048  }
  0x61   : > { %995 = sbr.rel (%p992_p9) target bundleno = 3547 (0xddb), region = 144  ;;  %s4245_s13 = sld [smem:[#allocation14_spill]] (!%p992_p9)  ;;  %vm3201_vm1 = vmpackc.low (!%p992_p9), %vm1129_vm0, %vm1129_vm0  ;;  %vm1477_vm5 = vcmask (!%p992_p9), 1041408   ;;  %vm1454_vm6 = vcmask (!%p992_p9), 48128   ;;  %vm1457_vm7 = vcmask (!%p992_p9), 97280   ;;  %vm1470_vm8 = vcmask (!%p992_p9), 146432  }
  0x62   : > { %p1099_p10 = scmp.lt.s32.totalorder (!%p992_p9), %s3816_s0, 1  ;;  %v1212_v14 = vshrl.u32 (!%p992_p9), %v1211_v13, 7  ;;  %v1215_v16 = vand.u32 (!%p992_p9), 127, %v1211_v13  ;;  %s4246_s21 = sld [smem:[#allocation16_spill]] (!%p992_p9)  ;;  %vm1758_vm11 = vcmask (!%p992_p9), 261120   ;;  %vm1774_vm12 = vcmask (!%p992_p9), 392192  }
  0x63   : > { %s4247_s3 = sld [smem:[#allocation17_spill]] (!%p992_p9)  ;;  %s4248_s14 = sld [smem:[#allocation19_spill]] (!%p992_p9)  ;;  %vm2058_vm15 = vcmask (!%p992_p9), 523264  }
  0x64   : > { %v1213_v15 = vadd.s32 (!%p992_p9), 8, %v1212_v14  ;;  %vm1216_vm3 = vcmp.eq.s32.totalorder (!%p992_p9), %v1212_v14, %v1215_v16  ;;  %s4249_s24 = sld [smem:[#allocation21_spill]] (!%p992_p9) }
  0x65   : > { %v2919_v19 = vsel (!%p992_p9), %vm1216_vm3, 1.0, %v3598_v17 }
  0x66   : > { %v2913_v0 = vld [vmem:[%s4243_s9] ss:$0 sm:$0xff] (!%p992_p9)  ;;  %vm1217_vm2 = vcmp.eq.s32.totalorder (!%p992_p9), %v1213_v15, %v1215_v16  ;;  %s3603_s9 = smov (!%p992_p9), 64  }
  0x67   : > { %v2914_v3 = vld [vmem:[%s4245_s13] ss:$0 sm:$0xff] (!%p992_p9)  ;;  %v2920_v18 = vsel (!%p992_p9), %vm1217_vm2, 1.0, %v3598_v17  ;;  %s4254_s13 = sld [smem:[#allocation24_spill]] (!%p992_p9) }
  0x68   : > { %s3847_s18 = scalar_select %p1099_p10, %s3816_s0, 1 }
  0x6a   : > { %s4191_s7 = sshll.u32 %s3847_s18, 4 }
  0x6b   : > { %s1103_s10 = scalar_lea.vmem %s4244_s5, %s4191_s7  ;;  %s3599_s5 = smov 6  }
  0x6c   : > { %v1109_v1 = vld [vmem:[%s1103_s10] sm:$0xff]  ;;  %v1110_v2 = vld [vmem:[%s1103_s10 + $0x8] sm:$0xff]  ;;  %s3878_s10 = sand.u32 1, %s3553_s23  }
  0x6d   : > { %v1118_v4 = vmul.f32 %v2913_v0, %v1109_v1  ;;  %v1119_v5 = vmul.f32 %v2913_v0, %v1110_v2  ;;  %s3881_s1 = sshll.u32 %s3878_s10, 4 }
  0x6e   : > { %s3888_s7 = scalar_lea.vmem [#allocation7], %s3881_s1 }
  0x6f   : > { %v3855_v6 = vadd.f32 %v2914_v3, %v1118_v4  ;;  %v3857_v7 = vadd.f32 %v2914_v3, %v1119_v5 }
  0x71   : > { %v3200_v8 = vpack.c.bf16 %v3857_v7, %v3855_v6  ;;  %3064 = vmatprep.mubr.msk.f32.mxu0 %vm1129_vm0, %v3855_v6  ;;  %v1222_v9 = vmul.f32 %v3855_v6, %v3855_v6  ;;  %v1223_v10 = vmul.f32 %v3857_v7, %v3857_v7 }
  0x73   : > { %3202 = vmatprep.subr.msk.bf16.mxu0 %vm3201_vm1, %v3200_v8  ;;  %v1224_v11 = vsel %vm1129_vm0, %v1222_v9, 0.0  ;;  %3207 = vmatprep.subr.bf16.mxu1 %v3200_v8  ;;  %v1227_v12 = vsel %vm1129_vm0, %v1223_v10, 0.0  ;;  %v1461_v9 = vld [vmem:[%s4238_s17 + $0x8] sm:$0xff] }
  0x74   : > { %3205 = vmatpush3.bf16.xpose.msk.msra.mxu0 %vm3201_vm1, %v3200_v8  ;;  %1225 = vadd.xlane.f32.xlu0 %v1224_v11  ;;  %v1462_v11 = vld [vmem:[%s4238_s17 + $0x10] sm:$0x3] }
  0x75   : > { %3209 = vmatpush3.bf16.msra.mxu1 %v3200_v8  ;;  %v1460_v8 = vld [vmem:[%s4238_s17] sm:$0xff]  ;;  %s4256_s17 = sld [smem:[#allocation26_spill]] }
  0x76   : > { %v3214_v10 = vpack.c.bf16 %v1461_v9, %v1460_v8 }
  0x78   : > { %1228 = vadd.xlane.f32.xlu0 %v1227_v12  ;;  %3215 = vmatprep.subr.bf16.mxu0 %v3214_v10 }
  0x7b   : > { %3065 = vmatmul.mubr.msk.f32.vlgmr.msra.gmra.mrb[0].mxu0 %vm1129_vm0, %v3857_v7  ;;  %vm2080_vm0 = vcmask 785408  }
  0x7c   : > { %3217 = vmatpush3.bf16.msra.mxu0 %v3214_v10  ;;  %v2935_v10 = vld [vmem:[%s4248_s14] ss:$0 sm:$0xff]  ;;  %s4255_s14 = sld [smem:[#allocation25_spill]] }
  0x7d   : > { %3085 = vmatprep.subr.msk.mxu0 %vm1477_vm5, %v1462_v11 }
  0x80   : > { %3086 = vmatpush3.msk.msra.mxu0 %vm1477_vm5, %v1462_v11 }
 0x101   : > { %v1226_v28 = vpop.xlane.xlu0 %1225 }
 0x105   : > { %v1229_v34 = vpop.xlane.xlu0 %1228 }
 0x14e   : > { %v3066_v20 = vpop.f32.mrb[0].mxu0 }
 0x14f   : > { %v1231_v21 = vmul.f32 %v3066_v20, %v2920_v18  ;;  %v1202_v22 = vpop.f32.mrb[1].mxu0  ;;  %v1243_v31 = vmul.f32 2.0, %v3066_v20 }
 0x150   : > { %v1230_v23 = vmul.f32 %v2919_v19, %v1202_v22  ;;  %v1242_v32 = vmul.f32 2.0, %v1202_v22 }
 0x151   : > { %v1234_v24 = vsel %vm1232_vm4, %v1231_v21, 0.0  ;;  %v1245_v38 = vsub.f32 %v1229_v34, %v1243_v31  ;;  %v1558_v31 = vld [vmem:[%s3643_s25] sm:$0xff] }
 0x152   : > { %v1233_v25 = vsel %vm1232_vm4, %v1230_v23, 0.0  ;;  %v1244_v36 = vsub.f32 %v1226_v28, %v1242_v32  ;;  %v1559_v28 = vld [vmem:[%s3643_s25 + $0x8] sm:$0xff]  ;;  %v2929_v34 = vld [vmem:[%s3648_s29] ss:$0 sm:$0xff] }
 0x153   : > { %v1235_v26 = vadd.f32 %v1234_v24, %v1233_v25 }
 0x155   : > { %v1236_v27 = vrot.slane %v1235_v26, 4 }
 0x157   : > { %v1237_v29 = vadd.f32 %v1236_v27, %v1235_v26  ;;  %v2925_v26 = vld [vmem:[%s4246_s21] ss:$0 sm:$0xff] }
 0x159   : > { %v1238_v30 = vrot.slane %v1237_v29, 2 }
 0x15b   : > { %v1239_v33 = vadd.f32 %v1238_v30, %v1237_v29 }
 0x15d   : > { %v1240_v35 = vrot.slane %v1239_v33, 1 }
 0x15f   : > { %v1241_v37 = vadd.f32 %v1240_v35, %v1239_v33 }
 0x161   : > { %v1246_v39 = vadd.f32 %v1244_v36, %v1241_v37  ;;  %v1247_v40 = vadd.f32 %v1245_v38, %v1241_v37  ;;  %v2930_v37 = vld [vmem:[%s4247_s3] ss:$0 sm:$0xff]  ;;  %s3601_s3 = smov 16  }
 0x163   : > { %v1248_v41 = vsub.f32 0.0, %v1246_v39  ;;  %v1249_v42 = vsub.f32 0.0, %v1247_v40 }
 0x165   : > { %v1250_v43 = vmul.f32 1.442695, %v1248_v41  ;;  %v1252_v44 = vmul.f32 1.442695, %v1249_v42 }
 0x167   : > { %3397 = vpow2.f32 %v1250_v43 }
 0x168   : > { %3399 = vpow2.f32 %v1252_v44 }
 0x171   : > { %v3398_v45 = vpop.eup %3397 }
 0x172   : > { %v3400_v46 = vpop.eup %3399  ;;  %v1254_v47 = vsel %vm1232_vm4, %v3398_v45, 0.0 }
 0x173   : > { %1255 = vadd.xlane.f32.xlu1 %v1254_v47  ;;  %v1257_v48 = vsel %vm1232_vm4, %v3400_v46, 0.0 }
 0x174   : > { %v1260_v49 = vadd.f32 %v1257_v48, %v1254_v47  ;;  %v1761_v47 = vld [vmem:[%s4240_s8] sm:$0xff] }
 0x176   : > { %v1261_v50 = vrot.slane %v1260_v49, 4 }
 0x177   : > { %1258 = vadd.xlane.f32.xlu1 %v1257_v48  ;;  %v1762_v48 = vld [vmem:[%s4240_s8 + $0x8] sm:$0xff] }
 0x178   : > { %v1262_v51 = vadd.f32 %v1261_v50, %v1260_v49  ;;  %v1763_v49 = vld [vmem:[%s4240_s8 + $0x10] sm:$0xff]  ;;  %v3226_v50 = vpack.c.bf16 %v1762_v48, %v1761_v47 }
 0x17a   : > { %v1263_v52 = vrot.slane %v1262_v51, 2  ;;  %3227 = vmatprep.subr.bf16.mxu0 %v3226_v50 }
 0x17c   : > { %v1264_v53 = vadd.f32 %v1263_v52, %v1262_v51  ;;  %v1764_v51 = vld [vmem:[%s4240_s8 + $0x18] sm:$0xff] }
 0x17d   : > { %v3230_v52 = vpack.c.bf16 %v1764_v51, %v1763_v49 }
 0x17e   : > { %v1265_v54 = vrot.slane %v1264_v53, 1 }
 0x180   : > { %v1266_v55 = vadd.f32 %v1265_v54, %v1264_v53  ;;  %v1765_v53 = vld [vmem:[%s4240_s8 + $0x20] sm:$0xff]  ;;  %v1766_v54 = vld [vmem:[%s4240_s8 + $0x28] sm:$0xff]  ;;  %s4250_s8 = smov 32  }
 0x200   : > { %v1256_v56 = vpop.xlane.xlu1 %1255 }
 0x201   : > { %3401 = vrsqrt.f32 %v1256_v56 }
 0x202   : > { %3403 = vrsqrt.f32 %v1266_v55  ;;  %v3234_v55 = vpack.c.bf16 %v1766_v54, %v1765_v53 }
 0x204   : > { %v1259_v57 = vpop.xlane.xlu1 %1258 }
 0x205   : > { %3405 = vrsqrt.f32 %v1259_v57 }
 0x20b   : > { %v3402_v58 = vpop.eup %3401 }
 0x20c   : > { %v1270_v59 = vmul.f32 %v3402_v58, %v3398_v45  ;;  %v3404_v60 = vpop.eup %3403 }
 0x20e   : > { %v1272_v61 = vmul.f32 %v3404_v60, %v1270_v59 }
 0x20f   : > { %v3406_v62 = vpop.eup %3405 }
 0x210   : > { %v3883_v63 = vsub.f32 %v2919_v19, %v1272_v61  ;;  %v1271_v0 = vmul.f32 %v3406_v62, %v3400_v46 }
 0x212   : > { %v1273_v1 = vmul.f32 %v3404_v60, %v1271_v0  ;;  %3071 = vmatprep.mubr.msk.f32.mxu1 %vm1232_vm4, %v3883_v63  ;;  %1276 = vst.msk [vmem:[%s3888_s7] sm:$0xff] %vm1232_vm4, %v3883_v63 }
 0x214   : > { %v3893_v2 = vsub.f32 %v2920_v18, %v1273_v1 }
 0x216   : > { %3072 = vmatmul.mubr.msk.f32.vlgmr.msra.gmra.mrb[0].mxu1 %vm1232_vm4, %v3893_v2  ;;  %1277 = vst.msk [vmem:[%s3888_s7 + $0x8] sm:$0xff] %vm1232_vm4, %v3893_v2 }
 0x217   : > { %3078 = vmatprep.mubr.msk.f32.mxu1 %vm1232_vm4, %v3883_v63 }
 0x2e9   : > { %v3073_v3 = vpop.f32.mrb[0].mxu1 }
 0x2ea   : > { %1442 = vrot.lane.b32.xlu1 %v3073_v3, %s3599_s5  ;;  %v1350_v4 = vpop.f32.mrb[1].mxu1 }
 0x2eb   : > { %v3210_v5 = vpack.c.bf16 %v3073_v3, %v1350_v4  ;;  %1440 = vrot.lane.b32.xlu0 %v1350_v4, %s3599_s5  ;;  %s3600_s5 = smov 12  }
 0x2ed   : > { %3211 = vmatprep.subr.bf16.mxu1 %v3210_v5 }
 0x2ee   : > { %3213 = vmatpush3.bf16.msra.mxu1 %v3210_v5 }
 0x2f1   : > { %3079 = vmatmul.mubr.msk.f32.vlgmr.msra.gmra.mrb[2].mxu1 %vm1232_vm4, %v3893_v2 }
 0x2f2   : > { %3094 = vmatprep.mubr.msk.f32.mxu1 %vm1232_vm4, %v3883_v63 }
 0x35c   : > { %v1443_v18 = vpop.permute.xlu1 %1442 }
 0x35d   : > { %v1441_v19 = vpop.permute.xlu0 %1440  ;;  %v1456_v23 = vsel %vm1454_vm6, %v3857_v7, %v1443_v18 }
 0x35e   : > { %v1455_v20 = vsel %vm1454_vm6, %v3855_v6, %v1441_v19 }
 0x3c4   : > { %v3080_v12 = vpop.f32.mrb[2].mxu1 }
 0x3c5   : > { %v1425_v13 = vpop.f32.mrb[3].mxu1  ;;  %v1435_v15 = vmul.f32 2.0, %v3080_v12  ;;  %v1859_v12 = vld [vmem:[%s4237_s19 + $0x8] sm:$0xff] }
 0x3c6   : > { %v1434_v14 = vmul.f32 2.0, %v1425_v13 }
 0x3c7   : > { %v1437_v17 = vsub.f32 %v1435_v15, %v3857_v7  ;;  %v1858_v15 = vld [vmem:[%s4237_s19] sm:$0xff]  ;;  %s3999_s19 = scalar_lea.vmem [#allocation6], %s3881_s1 }
 0x3c8   : > { %v1436_v16 = vsub.f32 %v1434_v14, %v3855_v6 }
 0x3ca   : > { %1448 = vrot.lane.b32.xlu1 %v1436_v16, %s3600_s5 }
 0x3ce   : > { %1450 = vrot.lane.b32.xlu1 %v1437_v17, %s3600_s5  ;;  %s3917_s5 = scalar_lea.vmem [#allocation2], %s3881_s1 }
 0x43c   : > { %v1449_v21 = vpop.permute.xlu1 %1448 }
 0x43d   : > { %v1458_v22 = vsel %vm1457_vm7, %v1455_v20, %v1449_v21  ;;  %v2938_v20 = vld [vmem:[%s4249_s24] ss:$0 sm:$0xff] }
 0x43e   : > { %3087 = vmatprep.mubr.msk.f32.mxu0 %vm1470_vm8, %v1458_v22 }
 0x440   : > { %v1451_v24 = vpop.permute.xlu1 %1450 }
 0x441   : > { %v1459_v25 = vsel %vm1457_vm7, %v1456_v23, %v1451_v24  ;;  %v2939_v23 = vld [vmem:[%s3678_s30] ss:$0 sm:$0xff] }
 0x442   : > { %3088 = vmatmul.mubr.msk.f32.vlgmr.msra.gmra.mrb[2].mxu0 %vm1470_vm8, %v1459_v25 }
 0x443   : > { %3229 = vmatpush3.bf16.msra.mxu0 %v3226_v50 }
 0x444   : > { %3231 = vmatprep.subr.bf16.mxu0 %v3230_v52 }
 0x447   : > { %3233 = vmatpush3.bf16.msra.mxu0 %v3230_v52 }
 0x448   : > { %3235 = vmatprep.subr.bf16.mxu0 %v3234_v55 }
 0x44b   : > { %3237 = vmatpush3.bf16.msra.mxu0 %v3234_v55 }
 0x515   : > { %v3089_v27 = vpop.f32.mrb[2].mxu0 }
 0x516   : > { %v1553_v29 = vadd.f32 %v3089_v27, %v2925_v26  ;;  %v1547_v30 = vpop.f32.mrb[3].mxu0 }
 0x517   : > { %v1548_v32 = vadd.f32 %v2925_v26, %v1547_v30 }
 0x518   : > { %1557 = vst.msk [vmem:[%s3917_s5 + $0x8] sm:$0xff] %vm1232_vm4, %v1553_v29  ;;  %v1561_v6 = vadd.f32 %v1559_v28, %v1553_v29 }
 0x519   : > { %1556 = vst.msk [vmem:[%s3917_s5] sm:$0xff] %vm1232_vm4, %v1548_v32  ;;  %v1560_v7 = vadd.f32 %v1558_v31, %v1548_v32 }
 0x51a   : > { %vm1563_vm9 = vcmp.ge.f32.partialorder %v1561_v6, 0.0  ;;  %v1565_v33 = vmul.f32 0.01, %v1561_v6 }
 0x51b   : > { %vm1562_vm10 = vcmp.ge.f32.partialorder %v1560_v7, 0.0  ;;  %v1564_v35 = vmul.f32 0.01, %v1560_v7 }
 0x51c   : > { %v1567_v36 = vsel %vm1563_vm9, %v1561_v6, %v1565_v33  ;;  %v2061_v6 = vld [vmem:[%s4239_s6] sm:$0xff]  ;;  %v2063_v33 = vld [vmem:[%s4239_s6 + $0x10] sm:$0xff] }
 0x51d   : > { %v1576_v38 = vmul.f32 %v2929_v34, %v1567_v36  ;;  %v1566_v39 = vsel %vm1562_vm10, %v1560_v7, %v1564_v35  ;;  %v2062_v7 = vld [vmem:[%s4239_s6 + $0x8] sm:$0xff]  ;;  %v2065_v36 = vld [vmem:[%s4239_s6 + $0x20] sm:$0xff] }
 0x51e   : > { %v1575_v40 = vmul.f32 %v2929_v34, %v1566_v39  ;;  %v2064_v34 = vld [vmem:[%s4239_s6 + $0x18] sm:$0xff]  ;;  %v2067_v39 = vld [vmem:[%s4239_s6 + $0x30] sm:$0xff] }
 0x51f   : > { %v1585_v41 = vadd.f32 %v2930_v37, %v1576_v38  ;;  %v3250_v35 = vpack.c.bf16 %v2064_v34, %v2063_v33 }
 0x520   : > { %v1584_v42 = vadd.f32 %v2930_v37, %v1575_v40  ;;  %v2066_v37 = vld [vmem:[%s4239_s6 + $0x28] sm:$0xff]  ;;  %v2068_v40 = vld [vmem:[%s4239_s6 + $0x38] sm:$0xff] }
 0x521   : > { %v3254_v38 = vpack.c.bf16 %v2066_v37, %v2065_v36 }
 0x522   : > { %v3218_v43 = vpack.c.bf16 %v1585_v41, %v1584_v42 }
 0x524   : > { %3219 = vmatprep.subr.bf16.mxu1 %v3218_v43 }
 0x525   : > { %3221 = vmatpush3.bf16.msra.mxu1 %v3218_v43 }
 0x528   : > { %3095 = vmatmul.mubr.msk.f32.vlgmr.msra.gmra.mrb[4].mxu1 %vm1232_vm4, %v3893_v2 }
 0x529   : > { %3101 = vmatprep.mubr.msk.f32.mxu1 %vm1232_vm4, %v3883_v63 }
 0x5fb   : > { %v3096_v44 = vpop.f32.mrb[4].mxu1 }
 0x5fc   : > { %1744 = vrot.lane.b32.xlu1 %v3096_v44, %s3601_s3  ;;  %v1652_v45 = vpop.f32.mrb[5].mxu1 }
 0x5fd   : > { %v3222_v46 = vpack.c.bf16 %v3096_v44, %v1652_v45  ;;  %1742 = vrot.lane.b32.xlu0 %v1652_v45, %s3601_s3  ;;  %s4192_s3 = smov 32   ;;  %v2071_v44 = vld [vmem:[%s4239_s6 + $0x50] sm:$0xff]  ;;  %v2072_v45 = vld [vmem:[%s4239_s6 + $0x58] sm:$0xff] }
 0x5ff   : > { %3223 = vmatprep.subr.bf16.mxu1 %v3222_v46 }
 0x600   : > { %3225 = vmatpush3.bf16.msra.mxu1 %v3222_v46  ;;  %v3266_v46 = vpack.c.bf16 %v2072_v45, %v2071_v44 }
 0x603   : > { %3102 = vmatmul.mubr.msk.f32.vlgmr.msra.gmra.mrb[6].mxu1 %vm1232_vm4, %v3893_v2 }
 0x604   : > { %3123 = vmatprep.mubr.msk.f32.mxu1 %vm1232_vm4, %v3883_v63 }
 0x66e   : > { %v1745_v62 = vpop.permute.xlu1 %1744 }
 0x66f   : > { %v1743_v0 = vpop.permute.xlu0 %1742  ;;  %v1757_v5 = vsel %vm1232_vm4, %v1585_v41, %v1745_v62 }
 0x670   : > { %v1756_v3 = vsel %vm1232_vm4, %v1584_v42, %v1743_v0 }
 0x6d6   : > { %v3103_v56 = vpop.f32.mrb[6].mxu1 }
 0x6d7   : > { %v1737_v57 = vmul.f32 2.0, %v3103_v56  ;;  %v1727_v58 = vpop.f32.mrb[7].mxu1 }
 0x6d8   : > { %v1736_v59 = vmul.f32 2.0, %v1727_v58 }
 0x6d9   : > { %v1739_v60 = vsub.f32 %v1737_v57, %v1585_v41  ;;  %v2069_v41 = vld [vmem:[%s4239_s6 + $0x40] sm:$0xff] }
 0x6da   : > { %v1738_v61 = vsub.f32 %v1736_v59, %v1584_v42  ;;  %v2070_v42 = vld [vmem:[%s4239_s6 + $0x48] sm:$0xff]  ;;  %s4252_s6 = sld [smem:[#allocation32_spill]] }
 0x6db   : > { %1752 = vrot.lane.b32.xlu1 %v1739_v60, %s4192_s3  ;;  %v3262_v43 = vpack.c.bf16 %v2070_v42, %v2069_v41 }
 0x6dc   : > { %1750 = vrot.lane.b32.xlu0 %v1738_v61, %s4192_s3  ;;  %s3949_s3 = scalar_lea.vmem [#allocation4], %s3881_s1  ;;  %s4260_s1 = sld [smem:[#allocation30_spill]] }
 0x6e2   : > { %v2952_v44 = vld [vmem:[%s4260_s1] ss:$0 sm:$0xff]  ;;  %s2654_s1 = sshll.u32 %s3949_s3, 4  ;;  %s4038_s1 = int_to_ptr.vmem [resolvable:$true] %s2654_s1 }
 0x74d   : > { %v1753_v1 = vpop.permute.xlu1 %1752 }
 0x74e   : > { %v1751_v4 = vpop.permute.xlu0 %1750  ;;  %v1760_v9 = vsel %vm1758_vm11, %v1757_v5, %v1753_v1  ;;  %v2303_v5 = vld [vmem:[%s4252_s6] sm:$0xff] }
 0x74f   : > { %v1759_v8 = vsel %vm1758_vm11, %v1756_v3, %v1751_v4 }
 0x750   : > { %3116 = vmatprep.mubr.msk.f32.mxu0 %vm1774_vm12, %v1759_v8  ;;  %v2304_v8 = vld [vmem:[%s4252_s6 + $0x8] sm:$0xff] }
 0x751   : > { %3117 = vmatmul.mubr.msk.f32.vlgmr.msra.gmra.mrb[4].mxu0 %vm1774_vm12, %v1760_v9  ;;  %v3278_v9 = vpack.c.bf16 %v2304_v8, %v2303_v5 }
 0x824   : > { %v3118_v11 = vpop.f32.mrb[4].mxu0 }
 0x825   : > { %v1853_v13 = vadd.f32 %v3118_v11, %v2935_v10  ;;  %v1847_v14 = vpop.f32.mrb[5].mxu0 }
 0x826   : > { %v1848_v16 = vadd.f32 %v2935_v10, %v1847_v14 }
 0x827   : > { %1857 = vst.msk [vmem:[%s3949_s3 + $0x8] sm:$0xff] %vm1758_vm11, %v1853_v13  ;;  %v1861_v17 = vadd.f32 %v1859_v12, %v1853_v13  ;;  %v2165_v12 = vld [vmem:[%s4254_s13 + $0x8] sm:$0xff] }
 0x828   : > { %1856 = vst.msk [vmem:[%s3949_s3] sm:$0xff] %vm1758_vm11, %v1848_v16  ;;  %v1860_v18 = vadd.f32 %v1858_v15, %v1848_v16  ;;  %v2164_v15 = vld [vmem:[%s4254_s13] sm:$0xff]  ;;  %s4263_s13 = sld [smem:[#allocation34_spill]] }
 0x829   : > { %vm1863_vm13 = vcmp.ge.f32.partialorder %v1861_v17, 0.0  ;;  %v1865_v19 = vmul.f32 0.01, %v1861_v17 }
 0x82a   : > { %vm1862_vm14 = vcmp.ge.f32.partialorder %v1860_v18, 0.0  ;;  %v1864_v21 = vmul.f32 0.01, %v1860_v18 }
 0x82b   : > { %v1867_v22 = vsel %vm1863_vm13, %v1861_v17, %v1865_v19 }
 0x82c   : > { %v1876_v24 = vmul.f32 %v2938_v20, %v1867_v22  ;;  %v1866_v25 = vsel %vm1862_vm14, %v1860_v18, %v1864_v21 }
 0x82d   : > { %v1875_v26 = vmul.f32 %v2938_v20, %v1866_v25  ;;  %v2947_v20 = vld [vmem:[%s4255_s14] ss:$0 sm:$0xff]  ;;  %s4258_s14 = sld [smem:[#allocation28_spill]] }
 0x82e   : > { %v3957_v27 = vadd.f32 %v2939_v23, %v1876_v24  ;;  %v2948_v25 = vld [vmem:[%s4256_s17] ss:$0 sm:$0xff]  ;;  %s4259_s17 = sld [smem:[#allocation29_spill]] }
 0x82f   : > { %v3959_v28 = vadd.f32 %v2939_v23, %v1875_v26 }
 0x831   : > { %v3238_v29 = vpack.c.bf16 %v3957_v27, %v3959_v28 }
 0x833   : > { %3239 = vmatprep.subr.bf16.mxu1 %v3238_v29  ;;  %v2197_v37 = vld [vmem:[%s4258_s14 + $0x8] sm:$0xff] }
 0x834   : > { %3241 = vmatpush3.bf16.msra.mxu1 %v3238_v29  ;;  %v2305_v29 = vld [vmem:[%s4252_s6 + $0x10] sm:$0xff] }
 0x837   : > { %3124 = vmatmul.mubr.msk.f32.vlgmr.msra.gmra.mrb[8].mxu1 %vm1232_vm4, %v3893_v2 }
 0x838   : > { %3130 = vmatprep.mubr.msk.f32.mxu1 %vm1232_vm4, %v3883_v63  ;;  %v3246_v63 = vpack.c.bf16 %v2062_v7, %v2061_v6 }
 0x90a   : > { %v3125_v30 = vpop.f32.mrb[8].mxu1 }
 0x90b   : > { %2044 = vrot.lane.b32.xlu1 %v3125_v30, %s4250_s8  ;;  %v1952_v31 = vpop.f32.mrb[9].mxu1 }
 0x90c   : > { %v3242_v32 = vpack.c.bf16 %v3125_v30, %v1952_v31  ;;  %2042 = vrot.lane.b32.xlu0 %v1952_v31, %s4250_s8  ;;  %s4251_s8 = sld [smem:[#allocation27_spill]]  ;;  %v2306_v30 = vld [vmem:[%s4252_s6 + $0x18] sm:$0xff]  ;;  %s4261_s6 = sld [smem:[#allocation36_spill]] }
 0x90d   : > { %v3282_v6 = vpack.c.bf16 %v2306_v30, %v2305_v29 }
 0x90e   : > { %3243 = vmatprep.subr.bf16.mxu1 %v3242_v32 }
 0x90f   : > { %3245 = vmatpush3.bf16.msra.mxu1 %v3242_v32 }
 0x910   : > { %3247 = vmatprep.subr.bf16.mxu1 %v3246_v63 }
 0x912   : > { %3131 = vmatmul.mubr.msk.f32.vlgmr.msra.gmra.mrb[10].mxu1 %vm1232_vm4, %v3893_v2  ;;  %v3258_v2 = vpack.c.bf16 %v2068_v40, %v2067_v39  ;;  %v2192_v61 = vld [vmem:[%s4251_s8] sm:$0xff]  ;;  %v2193_v62 = vld [vmem:[%s4251_s8 + $0x8] sm:$0xff]  ;;  %v2194_v1 = vld [vmem:[%s4251_s8 + $0x10] sm:$0xff] }
 0x913   : > { %3249 = vmatpush3.bf16.msra.mxu1 %v3246_v63  ;;  %v3270_v0 = vpack.c.bf16 %v2193_v62, %v2192_v61  ;;  %v2195_v3 = vld [vmem:[%s4251_s8 + $0x18] sm:$0xff]  ;;  %s4262_s8 = sld [smem:[#allocation33_spill]] }
 0x914   : > { %3251 = vmatprep.subr.bf16.mxu1 %v3250_v35  ;;  %v3274_v4 = vpack.c.bf16 %v2195_v3, %v2194_v1 }
 0x915   : > { %3271 = vmatprep.subr.bf16.mxu0 %v3270_v0 }
 0x916   : > { %3273 = vmatpush3.bf16.msra.mxu0 %v3270_v0 }
 0x917   : > { %3253 = vmatpush3.bf16.msra.mxu1 %v3250_v35  ;;  %3275 = vmatprep.subr.bf16.mxu0 %v3274_v4 }
 0x918   : > { %3255 = vmatprep.subr.bf16.mxu1 %v3254_v38 }
 0x91a   : > { %3277 = vmatpush3.bf16.msra.mxu0 %v3274_v4 }
 0x91b   : > { %3257 = vmatpush3.bf16.msra.mxu1 %v3254_v38  ;;  %3279 = vmatprep.subr.bf16.mxu0 %v3278_v9 }
 0x91c   : > { %3259 = vmatprep.subr.bf16.mxu1 %v3258_v2 }
 0x91f   : > { %3261 = vmatpush3.bf16.msra.mxu1 %v3258_v2 }
 0x920   : > { %3263 = vmatprep.subr.bf16.mxu1 %v3262_v43 }
 0x923   : > { %3265 = vmatpush3.bf16.msra.mxu1 %v3262_v43 }
 0x924   : > { %3267 = vmatprep.subr.bf16.mxu1 %v3266_v46 }
 0x927   : > { %3269 = vmatpush3.bf16.msra.mxu1 %v3266_v46 }
 0x97d   : > { %v2045_v53 = vpop.permute.xlu1 %2044 }
 0x97e   : > { %v2043_v54 = vpop.permute.xlu0 %2042  ;;  %v2057_v58 = vsel %vm1758_vm11, %v3957_v27, %v2045_v53 }
 0x97f   : > { %v2056_v56 = vsel %vm1758_vm11, %v3959_v28, %v2043_v54 }
 0x9e5   : > { %v3132_v47 = vpop.f32.mrb[10].mxu1 }
 0x9e6   : > { %v2037_v48 = vmul.f32 2.0, %v3132_v47  ;;  %v2027_v49 = vpop.f32.mrb[11].mxu1 }
 0x9e7   : > { %v2036_v50 = vmul.f32 2.0, %v2027_v49  ;;  %v2494_v49 = vld [vmem:[%s4261_s6 + $0x8] sm:$0xff] }
 0x9e8   : > { %v2039_v51 = vsub.f32 %v2037_v48, %v3957_v27  ;;  %v2493_v48 = vld [vmem:[%s4261_s6] sm:$0xff]  ;;  %s2670_s6 = sshll.u32 %s3999_s19, 4  ;;  %s4040_s6 = int_to_ptr.vmem [resolvable:$true] %s2670_s6 }
 0x9e9   : > { %v2038_v52 = vsub.f32 %v2036_v50, %v3959_v28  ;;  %v3294_v50 = vpack.c.bf16 %v2494_v49, %v2493_v48 }
 0x9ea   : > { %2052 = vrot.lane.b32.xlu1 %v2039_v51, %s3603_s9  ;;  %v2470_v51 = vld [vmem:[%s4262_s8 + $0x8] sm:$0xff] }
 0x9eb   : > { %2050 = vrot.lane.b32.xlu0 %v2038_v52, %s3603_s9  ;;  %s4253_s9 = sld [smem:[#allocation23_spill]]  ;;  %3295 = vmatprep.subr.bf16.mxu1 %v3294_v50  ;;  %v2469_v52 = vld [vmem:[%s4262_s8] sm:$0xff] }
 0x9f1   : > { %v2944_v10 = vld [vmem:[%s4253_s9] ss:$0 sm:$0xff]  ;;  %s4257_s9 = sld [smem:[#allocation31_spill]] }
 0x9f7   : > { %v2299_v7 = vld [vmem:[%s4257_s9] sm:$0xff]  ;;  %v2300_v33 = vld [vmem:[%s4257_s9 + $0x8] sm:$0xff]  ;;  %v2301_v34 = vld [vmem:[%s4257_s9 + $0x10] sm:$0xff] }
 0x9f8   : > { %v3286_v63 = vpack.c.bf16 %v2300_v33, %v2299_v7  ;;  %v2302_v35 = vld [vmem:[%s4257_s9 + $0x18] sm:$0xff]  ;;  %s4264_s9 = sld [smem:[#allocation35_spill]] }
 0x9f9   : > { %v3290_v36 = vpack.c.bf16 %v2302_v35, %v2301_v34 }
 0x9fe   : > { %v2958_v61 = vld [vmem:[%s4264_s9] ss:$0 sm:$0xff]  ;;  %s4044_s9 = sshll.u32 %s3816_s0, 8 }
 0x9ff   : > { %s4048_s8 = scalar_lea.hbm %s4236_s4, %s4044_s9 }
 0xa5c   : > { %v2053_v55 = vpop.permute.xlu1 %2052 }
 0xa5d   : > { %v2051_v57 = vpop.permute.xlu0 %2050  ;;  %v2060_v60 = vsel %vm2058_vm15, %v2057_v58, %v2053_v55 }
 0xa5e   : > { %v2059_v59 = vsel %vm2058_vm15, %v2056_v56, %v2051_v57  ;;  %v2957_v56 = vld [vmem:[%s4263_s13] ss:$0 sm:$0xff]  ;;  %s2611_s13 = sand.u32 1, %s3816_s0  }
 0xa5f   : > { %3157 = vmatprep.mubr.msk.f32.mxu1 %vm2080_vm0, %v2059_v59 }
 0xa60   : > { %3158 = vmatmul.mubr.msk.f32.vlgmr.msra.gmra.mrb[12].mxu1 %vm2080_vm0, %v2060_v60 }
 0xa61   : > { %3297 = vmatpush3.bf16.msra.mxu1 %v3294_v50 }
 0xb33   : > { %v3159_v11 = vpop.f32.mrb[12].mxu1 }
 0xb34   : > { %v2159_v13 = vadd.f32 %v3159_v11, %v2944_v10  ;;  %v2153_v14 = vpop.f32.mrb[13].mxu1 }
 0xb35   : > { %v2154_v16 = vadd.f32 %v2944_v10, %v2153_v14 }
 0xb36   : > { %2163 = vst.msk [vmem:[%s3999_s19 + $0x8] sm:$0xff] %vm1758_vm11, %v2159_v13  ;;  %v2167_v17 = vadd.f32 %v2165_v12, %v2159_v13 }
 0xb37   : > { %2162 = vst.msk [vmem:[%s3999_s19] sm:$0xff] %vm1758_vm11, %v2154_v16  ;;  %v2166_v18 = vadd.f32 %v2164_v15, %v2154_v16  ;;  %s3604_s19 = smov [#allocation4]  }
 0xb38   : > { %vm2169_vm1 = vcmp.ge.f32.partialorder %v2167_v17, 0.0  ;;  %v2171_v19 = vmul.f32 0.01, %v2167_v17  ;;  %s3411_s3 = sshll.u32 %s3604_s19, 4  ;;  %s3412_s3 = int_to_ptr.vmem [resolvable:$false] %s3411_s3 }
 0xb39   : > { %vm2168_vm2 = vcmp.ge.f32.partialorder %v2166_v18, 0.0  ;;  %v2170_v21 = vmul.f32 0.01, %v2166_v18  ;;  %s3413_s21 = scalar_lea.vmem %s3412_s3, 512  ;;  %p3414_p0 = scmp.lt.s32.totalorder %s4038_s1, %s3412_s3 }
 0xb3a   : > { %v2173_v22 = vsel %vm2169_vm1, %v2167_v17, %v2171_v19 }
 0xb3b   : > { %v2182_v23 = vmul.f32 %v2947_v20, %v2173_v22  ;;  %v2172_v24 = vsel %vm2168_vm2, %v2166_v18, %v2170_v21 }
 0xb3c   : > { %v2181_v26 = vmul.f32 %v2947_v20, %v2172_v24 }
 0xb3d   : > { %v2191_v32 = vadd.f32 %v2948_v25, %v2182_v23 }
 0xb3e   : > { %v2190_v31 = vadd.f32 %v2948_v25, %v2181_v26 }
 0xb40   : > { %3168 = vmatprep.mubr.msk.f32.mxu0 %vm1758_vm11, %v2190_v31 }
 0xb41   : > { %3169 = vmatmul.mubr.msk.f32.vlgmr.msra.gmra.mrb[6].mxu0 %vm1758_vm11, %v2191_v32 }
 0xb42   : > { %3281 = vmatpush3.bf16.msra.mxu0 %v3278_v9  ;;  %3179 = vmatprep.mubr.msk.f32.mxu0 %vm1758_vm11, %v3959_v28  ;;  %v2196_v28 = vld [vmem:[%s4258_s14] sm:$0xff]  ;;  %s4050_s14 = scalar_lea.sflag [#allocation5], %s2611_s13 }
 0xb43   : > { %3283 = vmatprep.subr.bf16.mxu0 %v3282_v6 }
 0xb46   : > { %3285 = vmatpush3.bf16.msra.mxu0 %v3282_v6 }
 0xb47   : > { %3287 = vmatprep.subr.bf16.mxu0 %v3286_v63 }
 0xb49   : > { %3180 = vmatmul.mubr.msk.f32.vlgmr.msra.gmra.mrb[8].mxu0 %vm1758_vm11, %v3957_v27  ;;  %v2951_v27 = vld [vmem:[%s4259_s17] ss:$0 sm:$0xff]  ;;  %s2638_s17 = sshll.u32 %s3917_s5, 4  ;;  %s3407_s5 = scalar_lea.vmem %s4038_s1, 256  ;;  %s4036_s17 = int_to_ptr.vmem [resolvable:$true] %s2638_s17 }
 0xb4a   : > { %3289 = vmatpush3.bf16.msra.mxu0 %v3286_v63  ;;  %p3408_p11 = scmp.ne.s32.totalorder %s4038_s1, %s3407_s5  ;;  %p3415_p1 = scmp.lt.s32.totalorder %s3413_s21, %s3407_s5 }
 0xb4b   : > { %3291 = vmatprep.subr.bf16.mxu0 %v3290_v36 }
 0xb4c   : > { %p3409_p12 = pnand %p3408_p11, %p3835_p5  ;;  %p3416_p2 = por %p3415_p1, %p3414_p0 }
 0xb4e   : > { %3293 = vmatpush3.bf16.msra.mxu0 %v3290_v36  ;;  %p3410_p13 = pneg %p3409_p12 }
 0xb50   : > { %p3417_p3 = pnand %p3416_p2, %p3410_p13 }
 0xc14   : > { %v3170_v38 = vpop.f32.mrb[6].mxu0 }
 0xc15   : > { %v2276_v39 = vadd.f32 %v3170_v38, %v2197_v37  ;;  %v2270_v40 = vpop.f32.mrb[7].mxu0 }
 0xc16   : > { %v2271_v2 = vadd.f32 %v2270_v40, %v2196_v28 }
 0xc17   : > { %v2280_v41 = vmax.f32 %v2276_v39, 0.0 }
 0xc18   : > { %v2279_v42 = vmax.f32 %v2271_v2, 0.0 }
 0xc19   : > { %v2289_v43 = vmul.f32 %v2951_v27, %v2280_v41 }
 0xc1a   : > { %v2288_v45 = vmul.f32 %v2951_v27, %v2279_v42 }
 0xc1b   : > { %v2298_v47 = vadd.f32 %v2952_v44, %v2289_v43 }
 0xc1c   : > { %v2297_v46 = vadd.f32 %v2952_v44, %v2288_v45 }
 0xc1e   : > { %3190 = vmatprep.mubr.msk.f32.mxu0 %vm1758_vm11, %v2297_v46 }
 0xc1f   : > { %3191 = vmatmul.mubr.msk.f32.vlgmr.msra.gmra.mrb[8].mxu0 %vm1758_vm11, %v2298_v47 }
 0xcf2   : > { %v3192_v53 = vpop.f32.mrb[8].mxu0 }
 0xcf3   : > { %v2472_v54 = vadd.f32 %v3192_v53, %v2470_v51  ;;  %v2460_v55 = vpop.f32.mrb[9].mxu0 }
 0xcf4   : > { %v2471_v57 = vadd.f32 %v2469_v52, %v2460_v55 }
 0xcf5   : > { %v2474_v58 = vmax.f32 %v2472_v54, 0.0 }
 0xcf6   : > { %v2473_v59 = vmax.f32 %v2471_v57, 0.0 }
 0xcf7   : > { %v2483_v60 = vmul.f32 %v2957_v56, %v2474_v58 }
 0xcf8   : > { %v2482_v62 = vmul.f32 %v2957_v56, %v2473_v59 }
 0xcf9   : > { %v2492_v1 = vadd.f32 %v2958_v61, %v2483_v60 }
 0xcfa   : > { %v2491_v0 = vadd.f32 %v2958_v61, %v2482_v62 }
 0xcfc   : > { %3197 = vmatprep.mubr.msk.f32.mxu1 %vm1232_vm4, %v2491_v0 }
 0xcfd   : > { %3198 = vmatmul.mubr.msk.f32.vlgmr.msra.gmra.mrb[14].mxu1 %vm1232_vm4, %v2492_v1 }
 0xcfe   : > { %3420 = shalt.err (!%p3417_p3)
}
 0xcff   : > { %s3421_s0 = scalar_lea.hbm %s4048_s8, 256  ;;  %s3425_s13 = scalar_lea.hbm %s4236_s4, 512 }
 0xd00   : > { %p3422_p4 = scmp.ne.s32.totalorder %s4048_s8, %s3421_s0  ;;  %p3426_p9 = scmp.lt.u32.totalorder %s4048_s8, %s4236_s4 }
 0xd01   : > { %p3427_p10 = scmp.lt.u32.totalorder %s3425_s13, %s3421_s0  ;;  %p3429_p12 = scmp.lt.u32.totalorder %s3421_s0, %s4048_s8 }
 0xd02   : > { %p3423_p7 = pnand %p3422_p4, %p3835_p5 }
 0xd03   : > { %p3428_p11 = por %p3427_p10, %p3426_p9 }
 0xd04   : > { %p3424_p8 = pneg %p3423_p7 }
 0xd05   : > { %p3430_p0 = por %p3429_p12, %p3428_p11 }
 0xd07   : > { %p3431_p13 = pnand %p3430_p0, %p3424_p8 }
 0xd09   : > { %3434 = shalt.err (!%p3431_p13)
}
 0xd0a   : > { %s3605_s21 = smov 128   ;;  %s3606_s5 = smov 8  }
 0xd0b   : > { %3301 = dma.vmem_to_hbm [thread:$0]  (%p3835_p5), %s4038_s1, 256, %s4048_s8, %s4050_s14, %s3605_s21, %s3605_s21, %s3606_s5  }
 0xd0c   : > { %s4075_s19 = scalar_lea.hbm %s3778_s27, %s4044_s9  ;;  %s2607_s3 = scalar_lea.sflag [#allocation3], %s3878_s10 }
 0xd0d   : > { %s3435_s0 = scalar_lea.vmem %s4036_s17, 256  ;;  %s3607_s13 = smov [#allocation2]  }
 0xd0e   : > { %p3436_p1 = scmp.ne.s32.totalorder %s4036_s17, %s3435_s0  ;;  %s3439_s4 = sshll.u32 %s3607_s13, 4  ;;  %s3440_s4 = int_to_ptr.vmem [resolvable:$false] %s3439_s4 }
 0xd0f   : > { %s3441_s24 = scalar_lea.vmem %s3440_s4, 512  ;;  %p3442_p4 = scmp.lt.s32.totalorder %s4036_s17, %s3440_s4 }
 0xd10   : > { %p3437_p2 = pnand %p3436_p1, %p3835_p5  ;;  %p3443_p7 = scmp.lt.s32.totalorder %s3441_s24, %s3435_s0 }
 0xd12   : > { %p3438_p3 = pneg %p3437_p2  ;;  %p3444_p8 = por %p3443_p7, %p3442_p4 }
 0xd14   : > { %p3445_p9 = pnand %p3444_p8, %p3438_p3 }
 0xd16   : > { %3448 = shalt.err (!%p3445_p9)
}
 0xd17   : > { %s3449_s8 = scalar_lea.hbm %s4075_s19, 256  ;;  %s3453_s1 = scalar_lea.hbm %s3778_s27, 512 }
 0xd18   : > { %p3450_p10 = scmp.ne.s32.totalorder %s4075_s19, %s3449_s8  ;;  %p3454_p0 = scmp.lt.u32.totalorder %s4075_s19, %s3778_s27 }
 0xd19   : > { %p3455_p13 = scmp.lt.u32.totalorder %s3453_s1, %s3449_s8  ;;  %p3457_p2 = scmp.lt.u32.totalorder %s3449_s8, %s4075_s19 }
 0xd1a   : > { %p3451_p11 = pnand %p3450_p10, %p3835_p5 }
 0xd1b   : > { %p3456_p1 = por %p3455_p13, %p3454_p0 }
 0xd1c   : > { %p3452_p12 = pneg %p3451_p11 }
 0xd1d   : > { %p3458_p4 = por %p3457_p2, %p3456_p1 }
 0xd1f   : > { %p3459_p3 = pnand %p3458_p4, %p3452_p12 }
 0xd21   : > { %3462 = shalt.err (!%p3459_p3)
}
 0xd22   : > { %3300 = dma.vmem_to_hbm [thread:$0]  (%p3835_p5), %s4036_s17, 256, %s4075_s19, %s2607_s3, %s3605_s21, %s3605_s21, %s3606_s5  }
 0xd23   : > { %s4102_s24 = scalar_lea.hbm %s3788_s12, %s4044_s9  ;;  %s3463_s4 = scalar_lea.vmem %s4040_s6, 256 }
 0xd24   : > { %p3464_p7 = scmp.ne.s32.totalorder %s4040_s6, %s3463_s4  ;;  %s3608_s0 = smov [#allocation6]  }
 0xd25   : > { %s3467_s13 = sshll.u32 %s3608_s0, 4  ;;  %s3468_s13 = int_to_ptr.vmem [resolvable:$false] %s3467_s13 }
 0xd26   : > { %p3465_p8 = pnand %p3464_p7, %p3835_p5  ;;  %s3469_s8 = scalar_lea.vmem %s3468_s13, 512 }
 0xd27   : > { %p3470_p10 = scmp.lt.s32.totalorder %s4040_s6, %s3468_s13  ;;  %p3471_p11 = scmp.lt.s32.totalorder %s3469_s8, %s3463_s4 }
 0xd28   : > { %p3466_p9 = pneg %p3465_p8 }
 0xd29   : > { %p3472_p12 = por %p3471_p11, %p3470_p10 }
 0xd2b   : > { %p3473_p0 = pnand %p3472_p12, %p3466_p9 }
 0xd2d   : > { %3476 = shalt.err (!%p3473_p0)
}
 0xd2e   : > { %s3477_s17 = scalar_lea.hbm %s4102_s24, 256  ;;  %s3481_s19 = scalar_lea.hbm %s3788_s12, 512 }
 0xd2f   : > { %p3478_p13 = scmp.ne.s32.totalorder %s4102_s24, %s3477_s17  ;;  %p3482_p4 = scmp.lt.u32.totalorder %s4102_s24, %s3788_s12 }
 0xd30   : > { %p3483_p3 = scmp.lt.u32.totalorder %s3481_s19, %s3477_s17  ;;  %p3485_p8 = scmp.lt.u32.totalorder %s3477_s17, %s4102_s24 }
 0xd31   : > { %p3479_p1 = pnand %p3478_p13, %p3835_p5 }
 0xd32   : > { %p3484_p7 = por %p3483_p3, %p3482_p4 }
 0xd33   : > { %p3480_p2 = pneg %p3479_p1 }
 0xd34   : > { %p3486_p10 = por %p3485_p8, %p3484_p7 }
 0xd36   : > { %p3487_p9 = pnand %p3486_p10, %p3480_p2 }
 0xd38   : > { %3490 = shalt.err (!%p3487_p9)
}
 0xd39   : > { %3302 = dma.vmem_to_hbm [thread:$0]  (%p3835_p5), %s4040_s6, 256, %s4102_s24, %s4050_s14, %s3605_s21, %s3605_s21, %s3606_s5  }
 0xd3a   : > { %s4127_s3 = scalar_lea.hbm %s3793_s20, %s4044_s9  ;;  %s2686_s1 = sshll.u32 %s3888_s7, 4  ;;  %s4130_s1 = int_to_ptr.vmem [resolvable:$true] %s2686_s1 }
 0xd3b   : > { %s2622_s4 = scalar_lea.sflag [#allocation8], %s3878_s10  ;;  %s3491_s0 = scalar_lea.vmem %s4130_s1, 256 }
 0xd3c   : > { %p3492_p11 = scmp.ne.s32.totalorder %s4130_s1, %s3491_s0  ;;  %s3609_s13 = smov [#allocation7]  }
 0xd3d   : > { %s3495_s8 = sshll.u32 %s3609_s13, 4  ;;  %s3496_s8 = int_to_ptr.vmem [resolvable:$false] %s3495_s8 }
 0xd3e   : > { %p3493_p12 = pnand %p3492_p11, %p3835_p5  ;;  %s3497_s17 = scalar_lea.vmem %s3496_s8, 512 }
 0xd3f   : > { %p3498_p13 = scmp.lt.s32.totalorder %s4130_s1, %s3496_s8  ;;  %p3499_p1 = scmp.lt.s32.totalorder %s3497_s17, %s3491_s0 }
 0xd40   : > { %p3494_p0 = pneg %p3493_p12 }
 0xd41   : > { %p3500_p2 = por %p3499_p1, %p3498_p13 }
 0xd43   : > { %p3501_p4 = pnand %p3500_p2, %p3494_p0 }
 0xd45   : > { %3504 = shalt.err (!%p3501_p4)
}
 0xd46   : > { %s3505_s6 = scalar_lea.hbm %s4127_s3, 256  ;;  %s3509_s7 = scalar_lea.hbm %s3793_s20, 512 }
 0xd47   : > { %p3506_p3 = scmp.ne.s32.totalorder %s4127_s3, %s3505_s6  ;;  %p3510_p10 = scmp.lt.u32.totalorder %s4127_s3, %s3793_s20 }
 0xd48   : > { %p3511_p9 = scmp.lt.u32.totalorder %s3509_s7, %s3505_s6  ;;  %p3513_p12 = scmp.lt.u32.totalorder %s3505_s6, %s4127_s3 }
 0xd49   : > { %p3507_p7 = pnand %p3506_p3, %p3835_p5 }
 0xd4a   : > { %p3512_p11 = por %p3511_p9, %p3510_p10 }
 0xd4b   : > { %p3508_p8 = pneg %p3507_p7 }
 0xd4c   : > { %p3514_p13 = por %p3513_p12, %p3512_p11 }
 0xd4e   : > { %p3515_p0 = pnand %p3514_p13, %p3508_p8 }
 0xd50   : > { %3518 = shalt.err (!%p3515_p0)
}
 0xd51   : > { %s4265_s14 = sld [smem:[#allocation37_spill]]  ;;  %s4266_s9 = sld [smem:[#allocation38_spill]]  ;;  %vm2598_vm3 = vcmask 64512  }
 0xd52   : > { %s4267_s24 = sld [smem:[#allocation39_spill]]  ;;  %s4268_s19 = sld [smem:[#allocation40_spill]] }
 0xd53   : > { %3303 = dma.vmem_to_hbm [thread:$0]  (%p3835_p5), %s4130_s1, 256, %s4127_s3, %s2622_s4, %s3605_s21, %s3605_s21, %s3606_s5  }
 0xd54   : > { %s4269_s15 = sshll.u32 %s3847_s18, 4 }
 0xd57   : > { %v2496_v3 = vld [vmem:[%s4265_s14 + $0x8] sm:$0xff]  ;;  %v2495_v4 = vld [vmem:[%s4265_s14] sm:$0xff] }
 0xd58   : > { %v2961_v10 = vld [vmem:[%s4266_s9] ss:$0 sm:$0xff]  ;;  %s1108_s10 = scalar_lea.vmem %s4268_s19, %s4269_s15 }
 0xd59   : > { %v2962_v13 = vld [vmem:[%s4267_s24] ss:$0 sm:$0xff] }
 0xdd0   : > { %v3199_v5 = vpop.f32.mrb[14].mxu1 }
 0xdd1   : > { %v2575_v8 = vadd.f32 %v3199_v5, %v2496_v3  ;;  %v2569_v9 = vpop.f32.mrb[15].mxu1 }
 0xdd2   : > { %v2570_v11 = vadd.f32 %v2569_v9, %v2495_v4 }
 0xdd3   : > { %v2579_v12 = vmax.f32 %v2575_v8, 0.0 }
 0xdd4   : > { %v2578_v14 = vmax.f32 %v2570_v11, 0.0 }
 0xdd5   : > { %v2588_v15 = vmul.f32 %v2961_v10, %v2579_v12 }
 0xdd6   : > { %v2587_v16 = vmul.f32 %v2961_v10, %v2578_v14 }
 0xdd7   : > { %v2597_v17 = vadd.f32 %v2962_v13, %v2588_v15 }
 0xdd8   : > { %v2596_v18 = vadd.f32 %v2962_v13, %v2587_v16 }
 0xdd9   : > { %2600 = vst.msk [vmem:[%s1108_s10 + $0x8] sm:$0xff] %vm2598_vm3, %v2597_v17 }
 0xdda   : > { %2599 = vst.msk [vmem:[%s1108_s10] sm:$0xff] %vm2598_vm3, %v2596_v18 }
 0xddb PF: > { %p3321_p5 = scmp.ge.s32.totalorder %s3561_s28, 2  ;;  %s2709_s21 = sand.u32 1, %s3549_s22  }
 0xddc   : > { %s2710_s5 = scalar_lea.sflag [#allocation3], %s2709_s21 }
 0xddd   : > { %p3309_p1 = pnand %p3321_p5, %p3839_p6 }
 0xddf   : > { %3536 = dma.done.wait (!%p3309_p1), %s2710_s5, 256  }
 0xde0   : > { %3538 = vsyncadd (!%p3309_p1), %s2710_s5, 4294967040  ;;  %s4270_s18 = sadd.s32 4294967294, %s3561_s28  }
 0xde1   : > { %s2718_s3 = sand.u32 1, %s4270_s18  }
 0xde2   : > { %s2719_s1 = scalar_lea.sflag [#allocation5], %s2718_s3 }
 0xde3   : > { %3540 = dma.done.wait (!%p3309_p1), %s2719_s1, 512  }
 0xde4   : > { %3542 = vsyncadd (!%p3309_p1), %s2719_s1, 4294966784  ;;  %s2737_s4 = scalar_lea.sflag [#allocation8], %s2709_s21 }
 0xde5   : > { %3544 = dma.done.wait (!%p3309_p1), %s2737_s4, 256  }
 0xde6   : > { %3546 = vsyncadd (!%p3309_p1), %s2737_s4, 4294967040  ;;  %p88_p2 = scmp.ge.s32.totalorder %s3820_s2, 4   ;;  %s4271_s22 = smov %s3553_s23 }
 0xde7   : > { %s4272_s23 = smov %s3557_s26  ;;  %s4273_s26 = smov %s3833_s11 }
 0xde8   : > { %s4274_s28 = smov %s3820_s2  ;;  %90 = sbr.rel (!%p88_p2) target bundleno = 83 (0x53), region = 275 }
 0xdef   :  { %2742 = vsyncpa [#allocation3], 1 }
 0xdf0   :  { %2744 = vsyncpa [#allocation3 + $0x1], 1 }
 0xdf1   :  { %2745 = vsyncpa [#allocation5], 1 }
 0xdf2   :  { %2747 = vsyncpa [#allocation5 + $0x1], 1 }
 0xdf3   :  { %2748 = vsyncpa [#allocation8], 1 }
 0xdf4   :  { %2750 = vsyncpa [#allocation8 + $0x1], 1 }

</bundles_post_ra>
